<compile_context>
chip_gen: v7x
topology: tpu7x:2x2x1
jax: 0.10.0
libtpu: 0.0.40
codegen_flags: <defaults>
</compile_context>

<pallas_src>
import math
from functools import partial

import jax
import jax.numpy as jnp
from jax.experimental import pallas as pl
from jax.experimental.pallas import tpu as pltpu


# ------------------------------ helpers ------------------------------------

def _round_up(n, m):
    return ((n + m - 1) // m) * m


def _pick_tile(n, cap=512):
    """Largest multiple-of-128 tile <= cap that divides n exactly (else n)."""
    if n <= cap:
        return n
    t = cap - (cap % 128)
    while t >= 128:
        if n % t == 0:
            return t
        t -= 128
    return n


def _pick_seq_tile(smax, cap=512):
    """Largest multiple-of-8 tile <= cap that divides smax exactly (else smax)."""
    t = min(smax, cap)
    t -= t % 8
    while t >= 8:
        if smax % t == 0:
            return t
        t -= 8
    return smax


def ffn_hidden_dim(dim, multiple_of, ffn_dim_multiplier=None):
    hidden = 4 * dim
    hidden = int(2 * hidden / 3)
    if ffn_dim_multiplier is not None:
        hidden = int(ffn_dim_multiplier * hidden)
    return multiple_of * ((hidden + multiple_of - 1) // multiple_of)


def precompute_freqs(head_dim, max_pos, theta=10000.0):
    inv = 1.0 / (theta ** (jnp.arange(0, head_dim, 2, dtype=jnp.float32) / head_dim))
    m = jnp.arange(max_pos, dtype=jnp.float32)
    freqs = jnp.outer(m, inv)                       # (max_pos, head_dim//2)
    return jnp.cos(freqs), jnp.sin(freqs)


def apply_rope(x, cos, sin):
    # x: (..., HD); cos/sin: (HD//2,).  Interleaved complex-pair rotation,
    # identical to torch.view_as_complex on (..., HD//2, 2).
    hd = x.shape[-1]
    xr = x.reshape(x.shape[:-1] + (hd // 2, 2))
    x_re, x_im = xr[..., 0], xr[..., 1]
    o_re = x_re * cos - x_im * sin
    o_im = x_re * sin + x_im * cos
    return jnp.stack([o_re, o_im], axis=-1).reshape(x.shape)


# ---------------------------- Pallas kernels --------------------------------

def _rmsnorm_linear_kernel(x_ref, nw_ref, w_ref, o_ref, *, eps):
    # x: (B, D) f32, nw: (1, D) f32, w: (D, tn) bf16 -> o: (B, tn) f32
    x = x_ref[...].astype(jnp.float32)
    ms = jnp.mean(x * x, axis=-1, keepdims=True)
    xn = (x * jax.lax.rsqrt(ms + eps)) * nw_ref[...]
    o_ref[...] = jnp.dot(xn.astype(w_ref.dtype), w_ref[...],
                         preferred_element_type=jnp.float32)


def rmsnorm_linear(x, norm_w, w_t, eps, *, tile_n_cap=512):
    """out = rmsnorm(x; norm_w) @ w_t, norm fused into the matmul kernel."""
    B, D = x.shape
    _, N = w_t.shape
    tn = _pick_tile(N, tile_n_cap)
    return pl.pallas_call(
        partial(_rmsnorm_linear_kernel, eps=eps),
        grid=(N // tn,),
        in_specs=[pl.BlockSpec((B, D), lambda j: (0, 0)),
                  pl.BlockSpec((1, D), lambda j: (0, 0)),
                  pl.BlockSpec((D, tn), lambda j: (0, j))],
        out_specs=pl.BlockSpec((B, tn), lambda j: (0, j)),
        out_shape=jax.ShapeDtypeStruct((B, N), jnp.float32),
        compiler_params=pltpu.CompilerParams(
            dimension_semantics=("parallel",)),
    )(x, norm_w, w_t)


def _linear_residual_kernel(a_ref, w_ref, r_ref, o_ref):
    # o = residual + a @ w   (single full-K matmul, residual folded in)
    o_ref[...] = r_ref[...] + jnp.dot(a_ref[...], w_ref[...],
                                      preferred_element_type=jnp.float32)


def linear_residual(a, w_t, res, *, tile_n_cap=512):
    B, K = a.shape
    _, N = w_t.shape
    tn = _pick_tile(N, tile_n_cap)
    return pl.pallas_call(
        _linear_residual_kernel,
        grid=(N // tn,),
        in_specs=[pl.BlockSpec((B, K), lambda j: (0, 0)),
                  pl.BlockSpec((K, tn), lambda j: (0, j)),
                  pl.BlockSpec((B, tn), lambda j: (0, j))],
        out_specs=pl.BlockSpec((B, tn), lambda j: (0, j)),
        out_shape=jax.ShapeDtypeStruct((B, N), jnp.float32),
        compiler_params=pltpu.CompilerParams(
            dimension_semantics=("parallel",)),
    )(a, w_t, res)


def _ffn_kernel(x_ref, hh_ref, nw_ref, w1_ref, w3_ref, w2_ref, o_ref, *, eps):
    # Fused rmsnorm + SwiGLU FFN + residual, grid (D_tiles, HIDDEN_tiles),
    # hidden (reduction) axis innermost; residual hh added at first hidden tile.
    hidx = pl.program_id(1)
    x = x_ref[...].astype(jnp.float32)
    ms = jnp.mean(x * x, axis=-1, keepdims=True)
    xn = (x * jax.lax.rsqrt(ms + eps)) * nw_ref[...]
    xb = xn.astype(w1_ref.dtype)
    h1 = jnp.dot(xb, w1_ref[...], preferred_element_type=jnp.float32)
    h3 = jnp.dot(xb, w3_ref[...], preferred_element_type=jnp.float32)
    g = (h1 * jax.nn.sigmoid(h1)) * h3                                 # f32 gate
    part = jnp.dot(g.astype(w2_ref.dtype), w2_ref[...],
                   preferred_element_type=jnp.float32)

    @pl.when(hidx == 0)
    def _():
        o_ref[...] = hh_ref[...] + part

    @pl.when(hidx > 0)
    def _():
        o_ref[...] = o_ref[...] + part


def feed_forward(x, hh, norm_w, w1_t, w3_t, w2_t, eps, *,
                 tile_h_cap=256, tile_d=None):
    """out = hh + w2(silu(w1(rmsnorm(x))) * w3(rmsnorm(x))).

    tile_h_cap=256 keeps streamed weight blocks within the default scoped-VMEM
    budget even on v7x; v5e/v6e (128 MiB VMEM) can raise it.  tile_d (default
    full D) can be set to a 128-multiple < D on v7x to give the parallel output
    axis >= 2 blocks (at the cost of re-streaming w1/w3)."""
    B, D = x.shape
    Hp = w1_t.shape[1]
    th = _pick_tile(Hp, tile_h_cap)
    td = D if tile_d is None else tile_d
    return pl.pallas_call(
        partial(_ffn_kernel, eps=eps),
        grid=(D // td, Hp // th),
        in_specs=[pl.BlockSpec((B, D), lambda d, h: (0, 0)),
                  pl.BlockSpec((B, td), lambda d, h: (0, d)),
                  pl.BlockSpec((1, D), lambda d, h: (0, 0)),
                  pl.BlockSpec((D, th), lambda d, h: (0, h)),
                  pl.BlockSpec((D, th), lambda d, h: (0, h)),
                  pl.BlockSpec((th, td), lambda d, h: (h, d))],
        out_specs=pl.BlockSpec((B, td), lambda d, h: (0, d)),
        out_shape=jax.ShapeDtypeStruct((B, D), jnp.float32),
        compiler_params=pltpu.CompilerParams(
            dimension_semantics=("parallel", "arbitrary")),
    )(x, hh, norm_w, w1_t, w3_t, w2_t)


def _attn_kernel(meta_ref, q_ref, k_ref, v_ref, o_ref, m_sc, l_sc, acc_sc, *,
                 scale, seq_tile):
    # Flash-style decode attention for one (batch b, kv-head g) group, tiled
    # over the cached sequence (innermost grid axis).  meta = [layer, start_pos,
    # last_needed_tile] (scalar-prefetched).  Tiles past start_pos are skipped
    # (their K/V block index is clamped in the index_map, so no extra DMA).
    s = pl.program_id(2)
    ns = pl.num_programs(2)
    start_pos = meta_ref[1]

    @pl.when(s == 0)
    def _():
        m_sc[...] = jnp.full_like(m_sc, -jnp.inf)
        l_sc[...] = jnp.zeros_like(l_sc)
        acc_sc[...] = jnp.zeros_like(acc_sc)

    @pl.when(s * seq_tile <= start_pos)
    def _():
        q = q_ref[0, 0]                       # (n_rep, HD) bf16
        k = k_ref[0, 0, 0]                    # (tS, HD)    bf16
        v = v_ref[0, 0, 0]                    # (tS, HD)    bf16
        sc = jax.lax.dot_general(q, k, (((1,), (1,)), ((), ())),
                                 preferred_element_type=jnp.float32) * scale
        pos = s * seq_tile + jax.lax.broadcasted_iota(jnp.int32, sc.shape, 1)
        sc = jnp.where(pos <= start_pos, sc, -jnp.inf)
        m_prev = m_sc[...]
        m_new = jnp.maximum(m_prev, jnp.max(sc, axis=-1, keepdims=True))
        alpha = jnp.exp(m_prev - m_new)
        p = jnp.exp(sc - m_new)
        l_sc[...] = alpha * l_sc[...] + jnp.sum(p, axis=-1, keepdims=True)
        acc_sc[...] = alpha * acc_sc[...] + jnp.dot(
            p.astype(v.dtype), v, preferred_element_type=jnp.float32)
        m_sc[...] = m_new

    @pl.when(s == ns - 1)
    def _():
        attn = acc_sc[...] * pl.reciprocal(l_sc[...], approx=True)
        o_ref[0, 0] = attn.astype(o_ref.dtype)


def flash_attention(layer_idx, start_pos, q4, cache_k, cache_v, scale, *,
                    seq_tile=None):
    """q4: (B, KVH, n_rep, HD) bf16; cache_k/v: (L, B, KVH, Smax, HD) bf16.
    Returns per-head context flattened to (B, H*HD) bf16 (head-major order)."""
    B, KVH, n_rep, HD = q4.shape
    Smax = cache_k.shape[3]
    tS = _pick_seq_tile(Smax) if seq_tile is None else seq_tile
    assert Smax % tS == 0
    NS = Smax // tS

    sp = jnp.asarray(start_pos, jnp.int32)
    meta = jnp.stack([jnp.int32(layer_idx), sp, sp // tS])   # (3,) int32

    def kv_map(b, g, s, m):
        # Layer baked in via prefetched scalar; clamp s to the last tile that
        # intersects [0, start_pos] so unneeded tiles reuse the same block.
        return (m[0], b, g, jnp.minimum(s, m[2]), 0)

    out = pl.pallas_call(
        partial(_attn_kernel, scale=scale, seq_tile=tS),
        grid_spec=pltpu.PrefetchScalarGridSpec(
            num_scalar_prefetch=1,
            grid=(B, KVH, NS),
            in_specs=[
                pl.BlockSpec((1, 1, n_rep, HD), lambda b, g, s, m: (b, g, 0, 0)),
                pl.BlockSpec((1, 1, 1, tS, HD), kv_map),
                pl.BlockSpec((1, 1, 1, tS, HD), kv_map),
            ],
            out_specs=pl.BlockSpec((1, 1, n_rep, HD),
                                   lambda b, g, s, m: (b, g, 0, 0)),
            scratch_shapes=[pltpu.VMEM((n_rep, 1), jnp.float32),
                            pltpu.VMEM((n_rep, 1), jnp.float32),
                            pltpu.VMEM((n_rep, HD), jnp.float32)],
        ),
        out_shape=jax.ShapeDtypeStruct((B, KVH, n_rep, HD), jnp.bfloat16),
        compiler_params=pltpu.CompilerParams(
            dimension_semantics=("parallel", "parallel", "arbitrary")),
    )(meta, q4, cache_k, cache_v)
    # (B, KVH, n_rep, HD) row-major flatten == head-major (h = g*n_rep + r),
    # matching the row order of wo^T.
    return out.reshape(B, KVH * n_rep * HD)


# ------------------------------ parameters ----------------------------------

def init_params(key, cfg):
    D = cfg["dim"]
    H = cfg["n_heads"]
    KVH = cfg["n_kv_heads"]
    HD = D // H
    HIDDEN = ffn_hidden_dim(D, cfg["multiple_of"], cfg.get("ffn_dim_multiplier"))
    H_pad = _round_up(HIDDEN, 128)     # zero-pad hidden to a 128 multiple
    V = cfg["vocab_size"]
    V_pad = _round_up(V, 128)          # zero-pad vocab to a 128 multiple

    def dense_t(k, in_f, out_f, pad_out=None):
        # nn.Linear(in_f, out_f, bias=False) weight, pre-transposed (in_f, out_f),
        # bf16 storage (f32 accumulation happens in-kernel).
        w = jax.random.normal(k, (in_f, out_f), jnp.float32) * 0.02
        if pad_out is not None and pad_out > out_f:
            w = jnp.pad(w, ((0, 0), (0, pad_out - out_f)))
        return w.astype(jnp.bfloat16)

    def dense_t_pad_in(k, in_f, out_f, pad_in):
        w = jax.random.normal(k, (in_f, out_f), jnp.float32) * 0.02
        if pad_in > in_f:
            w = jnp.pad(w, ((0, pad_in - in_f), (0, 0)))
        return w.astype(jnp.bfloat16)

    keys = jax.random.split(key, 2 + 7 * cfg["n_layers"])
    params = {
        "tok_embeddings": jax.random.normal(keys[0], (V, D), jnp.float32) * 0.02,
        "out_t": dense_t(keys[1], D, V, pad_out=V_pad),
        "norm": jnp.ones((1, D), jnp.float32),
        "layers": [],
    }
    ki = 2
    for _ in range(cfg["n_layers"]):
        wq_t = dense_t(keys[ki + 0], D, H * HD)
        wk_t = dense_t(keys[ki + 1], D, KVH * HD)
        wv_t = dense_t(keys[ki + 2], D, KVH * HD)
        layer = {
            "wqkv_t": jnp.concatenate([wq_t, wk_t, wv_t], axis=1),
            "wo_t": dense_t(keys[ki + 3], H * HD, D),
            "w1_t": dense_t(keys[ki + 4], D, HIDDEN, pad_out=H_pad),
            "w2_t": dense_t_pad_in(keys[ki + 5], HIDDEN, D, H_pad),
            "w3_t": dense_t(keys[ki + 6], D, HIDDEN, pad_out=H_pad),
            "attn_norm": jnp.ones((1, D), jnp.float32),
            "ffn_norm": jnp.ones((1, D), jnp.float32),
        }
        ki += 7
        params["layers"].append(layer)
    cos, sin = precompute_freqs(HD, cfg["max_seq_len"] * 2)
    params["freqs_cos"] = cos
    params["freqs_sin"] = sin
    return params


# ------------------------------ decode step ---------------------------------

def make_decode_step(cfg, *, attn_seq_tile=None, ffn_tile_h_cap=256,
                     proj_tile_n_cap=512):
    D = cfg["dim"]
    H = cfg["n_heads"]
    KVH = cfg["n_kv_heads"]
    HD = D // H
    n_rep = H // KVH
    eps = cfg["norm_eps"]
    V = cfg["vocab_size"]
    scale = 1.0 / math.sqrt(HD)
    nq = H * HD
    nkv = KVH * HD

    def step(params, token, start_pos, cache_k, cache_v):
        """token: (B, 1) int32, start_pos: traced int32 scalar.
        cache_k/v: (L, B, KVH, Smax, HD) bf16, donated (in-place update)."""
        B = token.shape[0]
        h = jnp.take(params["tok_embeddings"], token[:, 0], axis=0)     # (B, D)
        cos = jax.lax.dynamic_slice_in_dim(params["freqs_cos"], start_pos, 1, 0)[0]
        sin = jax.lax.dynamic_slice_in_dim(params["freqs_sin"], start_pos, 1, 0)[0]

        for li, layer in enumerate(params["layers"]):
            x = h                                                       # (B, D)
            # fused rmsnorm + QKV projection (one kernel, one weight read)
            qkv = rmsnorm_linear(x, layer["attn_norm"], layer["wqkv_t"], eps,
                                 tile_n_cap=proj_tile_n_cap)
            xq = qkv[:, :nq].reshape(B, KVH, n_rep, HD)
            xk = qkv[:, nq:nq + nkv].reshape(B, KVH, HD)
            xv = qkv[:, nq + nkv:].reshape(B, KVH, HD)

            xq = apply_rope(xq, cos, sin).astype(jnp.bfloat16)
            xk = apply_rope(xk, cos, sin).astype(jnp.bfloat16)
            xv = xv.astype(jnp.bfloat16)

            # in-place single-token bf16 KV cache update (donated buffers)
            cache_k = jax.lax.dynamic_update_slice(
                cache_k, xk[None, :, :, None, :], (li, 0, 0, start_pos, 0))
            cache_v = jax.lax.dynamic_update_slice(
                cache_v, xv[None, :, :, None, :], (li, 0, 0, start_pos, 0))

            # flash attention over the cached window (bf16 KV, f32 softmax)
            attn = flash_attention(li, start_pos, xq, cache_k, cache_v, scale,
                                   seq_tile=attn_seq_tile)              # (B, H*HD)
            # wo projection fused with the attention residual: hh = x + attn@wo
            hh = linear_residual(attn, layer["wo_t"], x,
                                 tile_n_cap=proj_tile_n_cap)            # (B, D)

            # NOTE: reference EncoderBlock feeds ffn_norm(x) (pre-attention x),
            # NOT ffn_norm(hh); reproduced exactly.  FFN residual (hh) is folded
            # into the kernel epilogue.
            h = feed_forward(x, hh, layer["ffn_norm"], layer["w1_t"],
                             layer["w3_t"], layer["w2_t"], eps,
                             tile_h_cap=ffn_tile_h_cap)                 # (B, D)

        # fused final rmsnorm + vocab projection (N-tiled, vocab zero-padded)
        logits = rmsnorm_linear(h, params["norm"], params["out_t"], eps,
                                tile_n_cap=proj_tile_n_cap)[:, :V]
        return (logits.reshape(B, 1, V).astype(jnp.float32), cache_k, cache_v)

    return jax.jit(step, donate_argnums=(3, 4))


# --------------------------------- main --------------------------------------

if __name__ == "__main__":
    cfg = dict(
        dim=64,
        n_layers=2,
        n_heads=4,
        n_kv_heads=2,
        vocab_size=128,
        multiple_of=32,
        norm_eps=1e-5,
        max_batch_size=2,
        max_seq_len=16,
    )
    B = cfg["max_batch_size"]
    L = cfg["n_layers"]
    KVH = cfg["n_kv_heads"]
    HD = cfg["dim"] // cfg["n_heads"]
    Smax = cfg["max_seq_len"]

    key = jax.random.PRNGKey(0)
    pkey, tkey = jax.random.split(key)
    params = init_params(pkey, cfg)

    # KV caches (L, B, KVH, Smax, HD) in bf16, updated in place via donation.
    cache_k = jnp.zeros((L, B, KVH, Smax, HD), jnp.bfloat16)
    cache_v = jnp.zeros((L, B, KVH, Smax, HD), jnp.bfloat16)

    # Small tiles here only to exercise the multi-tile (flash / hidden-accum)
    # paths at toy shapes; leave the defaults (None / 256) for production.
    decode_step = make_decode_step(cfg, attn_seq_tile=8, ffn_tile_h_cap=128)

    tokens = jax.random.randint(tkey, (B, 4), 0, cfg["vocab_size"], dtype=jnp.int32)

    logits = None
    for sp in range(3):                              # a few decode steps, one compile
        token = tokens[:, sp:sp + 1]                 # (B, 1)
        logits, cache_k, cache_v = decode_step(
            params, token, jnp.int32(sp), cache_k, cache_v)

    logits = jax.block_until_ready(logits)
    assert logits.shape == (B, 1, cfg["vocab_size"])
    assert logits.dtype == jnp.float32
    assert bool(jnp.all(jnp.isfinite(logits)))
    print("KERNEL_OK")
</pallas_src>

<mosaic_0001>
module attributes {stable_mosaic.version = 11 : i64} {
  func.func @_rmsnorm_linear_kernel(%arg0: i32, %arg1: memref<2x64xf32, #tpu.memory_space<vmem>>, %arg2: memref<1x64xf32, #tpu.memory_space<vmem>>, %arg3: memref<64x128xbf16, #tpu.memory_space<vmem>>, %arg4: memref<2x128xf32, #tpu.memory_space<vmem>>) attributes {dimension_semantics = [#tpu.dimension_semantics<parallel>], iteration_bounds = array<i64: 1>, scalar_prefetch = 0 : i64, scratch_operands = 0 : i64, tpu.core_type = #tpu.core_type<tc>, window_params = [{pipeline_mode = #tpu.pipeline_mode<synchronous>, transform_indices = @transform_0, window_bounds = array<i64: 2, 64>}, {pipeline_mode = #tpu.pipeline_mode<synchronous>, transform_indices = @transform_1, window_bounds = array<i64: 1, 64>}, {transform_indices = @transform_2, window_bounds = array<i64: 64, 128>}, {transform_indices = @transform_3, window_bounds = array<i64: 2, 128>}]} {
    %c0 = arith.constant 0 : index
    %c0_0 = arith.constant 0 : index
    %0 = vector.load %arg1[%c0, %c0_0] : memref<2x64xf32, #tpu.memory_space<vmem>>, vector<2x64xf32>
    %1 = arith.mulf %0, %0 : vector<2x64xf32>
    %cst = arith.constant dense<0.000000e+00> : vector<2xf32>
    %2 = vector.multi_reduction <add>, %1, %cst [1] : vector<2x64xf32> to vector<2xf32>
    %3 = vector.shape_cast %2 : vector<2xf32> to vector<2x1xf32>
    %cst_1 = arith.constant 6.400000e+01 : f32
    %4 = vector.broadcast %cst_1 : f32 to vector<2x1xf32>
    %5 = arith.divf %3, %4 : vector<2x1xf32>
    %cst_2 = arith.constant 9.99999974E-6 : f32
    %6 = vector.broadcast %cst_2 : f32 to vector<2x1xf32>
    %7 = arith.addf %5, %6 : vector<2x1xf32>
    %8 = math.rsqrt %7 : vector<2x1xf32>
    %9 = vector.broadcast %8 : vector<2x1xf32> to vector<2x64xf32>
    %10 = arith.mulf %0, %9 : vector<2x64xf32>
    %c0_3 = arith.constant 0 : index
    %c0_4 = arith.constant 0 : index
    %11 = vector.load %arg2[%c0_3, %c0_4] : memref<1x64xf32, #tpu.memory_space<vmem>>, vector<1x64xf32>
    %12 = vector.broadcast %11 : vector<1x64xf32> to vector<2x64xf32>
    %13 = arith.mulf %10, %12 : vector<2x64xf32>
    %14 = arith.truncf %13 : vector<2x64xf32> to vector<2x64xbf16>
    %c0_5 = arith.constant 0 : index
    %c0_6 = arith.constant 0 : index
    %15 = vector.load %arg3[%c0_5, %c0_6] : memref<64x128xbf16, #tpu.memory_space<vmem>>, vector<64x128xbf16>
    %cst_7 = arith.constant dense<0.000000e+00> : vector<2x128xf32>
    %16 = tpu.matmul %14, %15, %cst_7 {dimension_numbers = #tpu.dot_dimension_numbers<[1], [0], [0], [1], [0, 0, 1, 1], [], []>} : vector<2x64xbf16>, vector<64x128xbf16>, vector<2x128xf32> -> vector<2x128xf32>
    %c0_8 = arith.constant 0 : index
    %c0_9 = arith.constant 0 : index
    %17 = vector.load %arg4[%c0_8, %c0_9] : memref<2x128xf32, #tpu.memory_space<vmem>>, vector<2x128xf32>
    tpu.vector_store %arg4[%c0_8, %c0_9], %16 {strides = array<i32>} : memref<2x128xf32, #tpu.memory_space<vmem>>, vector<2x128xf32>,
    return
  }
  func.func @transform_0(%arg0: i32) -> (i32, i32) {
    %c0_i32 = arith.constant 0 : i32
    %c0_i32_0 = arith.constant 0 : i32
    %c0_i32_1 = arith.constant 0 : i32
    return %c0_i32, %c0_i32_0 : i32, i32
  }
  func.func @transform_1(%arg0: i32) -> (i32, i32) {
    %c0_i32 = arith.constant 0 : i32
    %c0_i32_0 = arith.constant 0 : i32
    %c0_i32_1 = arith.constant 0 : i32
    return %c0_i32, %c0_i32_0 : i32, i32
  }
  func.func @transform_2(%arg0: i32) -> (i32, i32) {
    %c0_i32 = arith.constant 0 : i32
    %c0_i32_0 = arith.constant 0 : i32
    return %c0_i32, %arg0 : i32, i32
  }
  func.func @transform_3(%arg0: i32) -> (i32, i32) {
    %c0_i32 = arith.constant 0 : i32
    %c0_i32_0 = arith.constant 0 : i32
    return %c0_i32, %arg0 : i32, i32
  }
}

module attributes {stable_mosaic.version = 11 : i64} {
  func.func @_attn_kernel(%arg0: i32, %arg1: i32, %arg2: i32, %arg3: memref<3xi32, #tpu.memory_space<smem>>, %arg4: memref<1x1x2x16xbf16, #tpu.memory_space<vmem>>, %arg5: memref<1x1x1x8x16xbf16, #tpu.memory_space<vmem>>, %arg6: memref<1x1x1x8x16xbf16, #tpu.memory_space<vmem>>, %arg7: memref<1x1x2x16xbf16, #tpu.memory_space<vmem>>, %arg8: memref<2x1xf32, #tpu.memory_space<vmem>>, %arg9: memref<2x1xf32, #tpu.memory_space<vmem>>, %arg10: memref<2x16xf32, #tpu.memory_space<vmem>>) attributes {dimension_semantics = [#tpu.dimension_semantics<parallel>, #tpu.dimension_semantics<parallel>, #tpu.dimension_semantics<arbitrary>], iteration_bounds = array<i64: 2, 2, 2>, scalar_prefetch = 1 : i64, scratch_operands = 3 : i64, tpu.core_type = #tpu.core_type<tc>, window_params = [{transform_indices = @transform_0, window_bounds = array<i64: 1, 1, 2, 16>}, {transform_indices = @transform_1, window_bounds = array<i64: 1, 1, 1, 8, 16>}, {transform_indices = @transform_2, window_bounds = array<i64: 1, 1, 1, 8, 16>}, {transform_indices = @transform_3, window_bounds = array<i64: 1, 1, 2, 16>}]} {
    %c1 = arith.constant 1 : index
    %0 = memref.load %arg3[%c1] : memref<3xi32, #tpu.memory_space<smem>>
    %c0_i32 = arith.constant 0 : i32
    %1 = arith.cmpi eq, %arg2, %c0_i32 : i32
    %2 = arith.extui %1 : i1 to i32
    %c0_i32_0 = arith.constant 0 : i32
    %3 = arith.cmpi ne, %2, %c0_i32_0 : i32
    scf.if %3 {
      %cst = arith.constant 0xFF800000 : f32
      %11 = vector.broadcast %cst : f32 to vector<2x1xf32>
      %c0 = arith.constant 0 : index
      %c0_3 = arith.constant 0 : index
      %12 = vector.load %arg8[%c0, %c0_3] : memref<2x1xf32, #tpu.memory_space<vmem>>, vector<2x1xf32>
      tpu.vector_store %arg8[%c0, %c0_3], %11 {strides = array<i32>} : memref<2x1xf32, #tpu.memory_space<vmem>>, vector<2x1xf32>,
      %cst_4 = arith.constant 0.000000e+00 : f32
      %13 = vector.broadcast %cst_4 : f32 to vector<2x1xf32>
      %c0_5 = arith.constant 0 : index
      %c0_6 = arith.constant 0 : index
      %14 = vector.load %arg9[%c0_5, %c0_6] : memref<2x1xf32, #tpu.memory_space<vmem>>, vector<2x1xf32>
      tpu.vector_store %arg9[%c0_5, %c0_6], %13 {strides = array<i32>} : memref<2x1xf32, #tpu.memory_space<vmem>>, vector<2x1xf32>,
      %cst_7 = arith.constant 0.000000e+00 : f32
      %15 = vector.broadcast %cst_7 : f32 to vector<2x16xf32>
      %c0_8 = arith.constant 0 : index
      %c0_9 = arith.constant 0 : index
      %16 = vector.load %arg10[%c0_8, %c0_9] : memref<2x16xf32, #tpu.memory_space<vmem>>, vector<2x16xf32>
      tpu.vector_store %arg10[%c0_8, %c0_9], %15 {strides = array<i32>} : memref<2x16xf32, #tpu.memory_space<vmem>>, vector<2x16xf32>,
    } else {
    }
    %c8_i32 = arith.constant 8 : i32
    %4 = arith.muli %arg2, %c8_i32 : i32
    %5 = arith.cmpi sle, %4, %0 : i32
    %6 = arith.extui %5 : i1 to i32
    %c0_i32_1 = arith.constant 0 : i32
    %7 = arith.cmpi ne, %6, %c0_i32_1 : i32
    scf.if %7 {
      %c0 = arith.constant 0 : index
      %c0_3 = arith.constant 0 : index
      %c0_4 = arith.constant 0 : index
      %c0_5 = arith.constant 0 : index
      %11 = vector.load %arg4[%c0, %c0_3, %c0_4, %c0_5] : memref<1x1x2x16xbf16, #tpu.memory_space<vmem>>, vector<1x1x2x16xbf16>
      %12 = vector.shape_cast %11 : vector<1x1x2x16xbf16> to vector<2x16xbf16>
      %c0_6 = arith.constant 0 : index
      %c0_7 = arith.constant 0 : index
      %c0_8 = arith.constant 0 : index
      %c0_9 = arith.constant 0 : index
      %c0_10 = arith.constant 0 : index
      %13 = vector.load %arg5[%c0_6, %c0_7, %c0_8, %c0_9, %c0_10] : memref<1x1x1x8x16xbf16, #tpu.memory_space<vmem>>, vector<1x1x1x8x16xbf16>
      %14 = vector.shape_cast %13 : vector<1x1x1x8x16xbf16> to vector<8x16xbf16>
      %c0_11 = arith.constant 0 : index
      %c0_12 = arith.constant 0 : index
      %c0_13 = arith.constant 0 : index
      %c0_14 = arith.constant 0 : index
      %c0_15 = arith.constant 0 : index
      %15 = vector.load %arg6[%c0_11, %c0_12, %c0_13, %c0_14, %c0_15] : memref<1x1x1x8x16xbf16, #tpu.memory_space<vmem>>, vector<1x1x1x8x16xbf16>
      %16 = vector.shape_cast %15 : vector<1x1x1x8x16xbf16> to vector<8x16xbf16>
      %cst = arith.constant dense<0.000000e+00> : vector<2x8xf32>
      %17 = tpu.matmul %12, %14, %cst {dimension_numbers = #tpu.dot_dimension_numbers<[1], [1], [0], [0], [0, 0, 1, 0], [], []>} : vector<2x16xbf16>, vector<8x16xbf16>, vector<2x8xf32> -> vector<2x8xf32>
      %cst_16 = arith.constant 2.500000e-01 : f32
      %18 = vector.broadcast %cst_16 : f32 to vector<2x8xf32>
      %19 = arith.mulf %17, %18 : vector<2x8xf32>
      %c8_i32_17 = arith.constant 8 : i32
      %20 = arith.muli %arg2, %c8_i32_17 : i32
      %21 = tpu.iota {dimensions = array<i32: 1>} : vector<2x8xi32>
      %22 = vector.broadcast %20 : i32 to vector<2x8xi32>
      %23 = arith.addi %22, %21 : vector<2x8xi32>
      %24 = vector.broadcast %0 : i32 to vector<2x8xi32>
      %25 = arith.cmpi sle, %23, %24 : vector<2x8xi32>
      %cst_18 = arith.constant 0xFF800000 : f32
      %26 = vector.broadcast %cst_18 : f32 to vector<2x8xf32>
      %27 = arith.select %25, %19, %26 : vector<2x8xi1>, vector<2x8xf32>
      %c0_19 = arith.constant 0 : index
      %c0_20 = arith.constant 0 : index
      %28 = vector.load %arg8[%c0_19, %c0_20] : memref<2x1xf32, #tpu.memory_space<vmem>>, vector<2x1xf32>
      %cst_21 = arith.constant dense<0xFF800000> : vector<2xf32>
      %29 = vector.multi_reduction <maximumf>, %27, %cst_21 [1] : vector<2x8xf32> to vector<2xf32>
      %30 = vector.shape_cast %29 : vector<2xf32> to vector<2x1xf32>
      %31 = arith.maximumf %28, %30 : vector<2x1xf32>
      %32 = arith.subf %28, %31 : vector<2x1xf32>
      %33 = math.exp %32 : vector<2x1xf32>
      %34 = vector.broadcast %31 : vector<2x1xf32> to vector<2x8xf32>
      %35 = arith.subf %27, %34 : vector<2x8xf32>
      %36 = math.exp %35 : vector<2x8xf32>
      %c0_22 = arith.constant 0 : index
      %c0_23 = arith.constant 0 : index
      %37 = vector.load %arg9[%c0_22, %c0_23] : memref<2x1xf32, #tpu.memory_space<vmem>>, vector<2x1xf32>
      %38 = arith.mulf %33, %37 : vector<2x1xf32>
      %cst_24 = arith.constant dense<0.000000e+00> : vector<2xf32>
      %39 = vector.multi_reduction <add>, %36, %cst_24 [1] : vector<2x8xf32> to vector<2xf32>
      %40 = vector.shape_cast %39 : vector<2xf32> to vector<2x1xf32>
      %41 = arith.addf %38, %40 : vector<2x1xf32>
      %c0_25 = arith.constant 0 : index
      %c0_26 = arith.constant 0 : index
      %42 = vector.load %arg9[%c0_25, %c0_26] : memref<2x1xf32, #tpu.memory_space<vmem>>, vector<2x1xf32>
      tpu.vector_store %arg9[%c0_25, %c0_26], %41 {strides = array<i32>} : memref<2x1xf32, #tpu.memory_space<vmem>>, vector<2x1xf32>,
      %c0_27 = arith.constant 0 : index
      %c0_28 = arith.constant 0 : index
      %43 = vector.load %arg10[%c0_27, %c0_28] : memref<2x16xf32, #tpu.memory_space<vmem>>, vector<2x16xf32>
      %44 = vector.broadcast %33 : vector<2x1xf32> to vector<2x16xf32>
      %45 = arith.mulf %44, %43 : vector<2x16xf32>
      %46 = arith.truncf %36 : vector<2x8xf32> to vector<2x8xbf16>
      %cst_29 = arith.constant dense<0.000000e+00> : vector<2x16xf32>
      %47 = tpu.matmul %46, %16, %cst_29 {dimension_numbers = #tpu.dot_dimension_numbers<[1], [0], [0], [1], [0, 0, 1, 1], [], []>} : vector<2x8xbf16>, vector<8x16xbf16>, vector<2x16xf32> -> vector<2x16xf32>
      %48 = arith.addf %45, %47 : vector<2x16xf32>
      %c0_30 = arith.constant 0 : index
      %c0_31 = arith.constant 0 : index
      %49 = vector.load %arg10[%c0_30, %c0_31] : memref<2x16xf32, #tpu.memory_space<vmem>>, vector<2x16xf32>
      tpu.vector_store %arg10[%c0_30, %c0_31], %48 {strides = array<i32>} : memref<2x16xf32, #tpu.memory_space<vmem>>, vector<2x16xf32>,
      %c0_32 = arith.constant 0 : index
      %c0_33 = arith.constant 0 : index
      %50 = vector.load %arg8[%c0_32, %c0_33] : memref<2x1xf32, #tpu.memory_space<vmem>>, vector<2x1xf32>
      tpu.vector_store %arg8[%c0_32, %c0_33], %31 {strides = array<i32>} : memref<2x1xf32, #tpu.memory_space<vmem>>, vector<2x1xf32>,
    } else {
    }
    %c1_i32 = arith.constant 1 : i32
    %8 = arith.cmpi eq, %arg2, %c1_i32 : i32
    %9 = arith.extui %8 : i1 to i32
    %c0_i32_2 = arith.constant 0 : i32
    %10 = arith.cmpi ne, %9, %c0_i32_2 : i32
    scf.if %10 {
      %c0 = arith.constant 0 : index
      %c0_3 = arith.constant 0 : index
      %11 = vector.load %arg10[%c0, %c0_3] : memref<2x16xf32, #tpu.memory_space<vmem>>, vector<2x16xf32>
      %c0_4 = arith.constant 0 : index
      %c0_5 = arith.constant 0 : index
      %12 = vector.load %arg9[%c0_4, %c0_5] : memref<2x1xf32, #tpu.memory_space<vmem>>, vector<2x1xf32>
      %13 = tpu.reciprocal %12 {approx = true} : vector<2x1xf32> -> vector<2x1xf32>
      %14 = vector.broadcast %13 : vector<2x1xf32> to vector<2x16xf32>
      %15 = arith.mulf %11, %14 : vector<2x16xf32>
      %16 = arith.truncf %15 : vector<2x16xf32> to vector<2x16xbf16>
      %c0_6 = arith.constant 0 : index
      %c0_7 = arith.constant 0 : index
      %c0_8 = arith.constant 0 : index
      %c0_9 = arith.constant 0 : index
      %17 = vector.load %arg7[%c0_6, %c0_7, %c0_8, %c0_9] : memref<1x1x2x16xbf16, #tpu.memory_space<vmem>>, vector<1x1x2x16xbf16>
      %18 = vector.shape_cast %17 : vector<1x1x2x16xbf16> to vector<2x16xbf16>
      %19 = vector.shape_cast %16 : vector<2x16xbf16> to vector<1x1x2x16xbf16>
      tpu.vector_store %arg7[%c0_6, %c0_7, %c0_8, %c0_9], %19 {strides = array<i32>} : memref<1x1x2x16xbf16, #tpu.memory_space<vmem>>, vector<1x1x2x16xbf16>,
    } else {
    }
    return
  }
  func.func @transform_0(%arg0: i32, %arg1: i32, %arg2: i32, %arg3: memref<3xi32, #tpu.memory_space<smem>>) -> (i32, i32, i32, i32) {
    %c0_i32 = arith.constant 0 : i32
    %c0_i32_0 = arith.constant 0 : i32
    %c0_i32_1 = arith.constant 0 : i32
    return %arg0, %arg1, %c0_i32, %c0_i32_0 : i32, i32, i32, i32
  }
  func.func @transform_1(%arg0: i32, %arg1: i32, %arg2: i32, %arg3: memref<3xi32, #tpu.memory_space<smem>>) -> (i32, i32, i32, i32, i32) {
    %c0 = arith.constant 0 : index
    %0 = memref.load %arg3[%c0] : memref<3xi32, #tpu.memory_space<smem>>
    %c2 = arith.constant 2 : index
    %1 = memref.load %arg3[%c2] : memref<3xi32, #tpu.memory_space<smem>>
    %2 = arith.minsi %arg2, %1 : i32
    %c0_i32 = arith.constant 0 : i32
    %c0_i32_0 = arith.constant 0 : i32
    return %0, %arg0, %arg1, %2, %c0_i32 : i32, i32, i32, i32, i32
  }
  func.func @transform_2(%arg0: i32, %arg1: i32, %arg2: i32, %arg3: memref<3xi32, #tpu.memory_space<smem>>) -> (i32, i32, i32, i32, i32) {
    %c0 = arith.constant 0 : index
    %0 = memref.load %arg3[%c0] : memref<3xi32, #tpu.memory_space<smem>>
    %c2 = arith.constant 2 : index
    %1 = memref.load %arg3[%c2] : memref<3xi32, #tpu.memory_space<smem>>
    %2 = arith.minsi %arg2, %1 : i32
    %c0_i32 = arith.constant 0 : i32
    %c0_i32_0 = arith.constant 0 : i32
    return %0, %arg0, %arg1, %2, %c0_i32 : i32, i32, i32, i32, i32
  }
  func.func @transform_3(%arg0: i32, %arg1: i32, %arg2: i32, %arg3: memref<3xi32, #tpu.memory_space<smem>>) -> (i32, i32, i32, i32) {
    %c0_i32 = arith.constant 0 : i32
    %c0_i32_0 = arith.constant 0 : i32
    %c0_i32_1 = arith.constant 0 : i32
    return %arg0, %arg1, %c0_i32, %c0_i32_0 : i32, i32, i32, i32
  }
}

module attributes {stable_mosaic.version = 11 : i64} {
  func.func @_linear_residual_kernel(%arg0: i32, %arg1: memref<2x64xbf16, #tpu.memory_space<vmem>>, %arg2: memref<64x64xbf16, #tpu.memory_space<vmem>>, %arg3: memref<2x64xf32, #tpu.memory_space<vmem>>, %arg4: memref<2x64xf32, #tpu.memory_space<vmem>>) attributes {dimension_semantics = [#tpu.dimension_semantics<parallel>], iteration_bounds = array<i64: 1>, scalar_prefetch = 0 : i64, scratch_operands = 0 : i64, tpu.core_type = #tpu.core_type<tc>, window_params = [{pipeline_mode = #tpu.pipeline_mode<synchronous>, transform_indices = @transform_0, window_bounds = array<i64: 2, 64>}, {transform_indices = @transform_1, window_bounds = array<i64: 64, 64>}, {transform_indices = @transform_2, window_bounds = array<i64: 2, 64>}, {transform_indices = @transform_3, window_bounds = array<i64: 2, 64>}]} {
    %c0 = arith.constant 0 : index
    %c0_0 = arith.constant 0 : index
    %0 = vector.load %arg3[%c0, %c0_0] : memref<2x64xf32, #tpu.memory_space<vmem>>, vector<2x64xf32>
    %c0_1 = arith.constant 0 : index
    %c0_2 = arith.constant 0 : index
    %1 = vector.load %arg1[%c0_1, %c0_2] : memref<2x64xbf16, #tpu.memory_space<vmem>>, vector<2x64xbf16>
    %c0_3 = arith.constant 0 : index
    %c0_4 = arith.constant 0 : index
    %2 = vector.load %arg2[%c0_3, %c0_4] : memref<64x64xbf16, #tpu.memory_space<vmem>>, vector<64x64xbf16>
    %cst = arith.constant dense<0.000000e+00> : vector<2x64xf32>
    %3 = tpu.matmul %1, %2, %cst {dimension_numbers = #tpu.dot_dimension_numbers<[1], [0], [0], [1], [0, 0, 1, 1], [], []>} : vector<2x64xbf16>, vector<64x64xbf16>, vector<2x64xf32> -> vector<2x64xf32>
    %4 = arith.addf %0, %3 : vector<2x64xf32>
    %c0_5 = arith.constant 0 : index
    %c0_6 = arith.constant 0 : index
    %5 = vector.load %arg4[%c0_5, %c0_6] : memref<2x64xf32, #tpu.memory_space<vmem>>, vector<2x64xf32>
    tpu.vector_store %arg4[%c0_5, %c0_6], %4 {strides = array<i32>} : memref<2x64xf32, #tpu.memory_space<vmem>>, vector<2x64xf32>,
    return
  }
  func.func @transform_0(%arg0: i32) -> (i32, i32) {
    %c0_i32 = arith.constant 0 : i32
    %c0_i32_0 = arith.constant 0 : i32
    %c0_i32_1 = arith.constant 0 : i32
    return %c0_i32, %c0_i32_0 : i32, i32
  }
  func.func @transform_1(%arg0: i32) -> (i32, i32) {
    %c0_i32 = arith.constant 0 : i32
    %c0_i32_0 = arith.constant 0 : i32
    return %c0_i32, %arg0 : i32, i32
  }
  func.func @transform_2(%arg0: i32) -> (i32, i32) {
    %c0_i32 = arith.constant 0 : i32
    %c0_i32_0 = arith.constant 0 : i32
    return %c0_i32, %arg0 : i32, i32
  }
  func.func @transform_3(%arg0: i32) -> (i32, i32) {
    %c0_i32 = arith.constant 0 : i32
    %c0_i32_0 = arith.constant 0 : i32
    return %c0_i32, %arg0 : i32, i32
  }
}

module attributes {stable_mosaic.version = 11 : i64} {
  func.func @_ffn_kernel(%arg0: i32, %arg1: i32, %arg2: memref<2x64xf32, #tpu.memory_space<vmem>>, %arg3: memref<2x64xf32, #tpu.memory_space<vmem>>, %arg4: memref<1x64xf32, #tpu.memory_space<vmem>>, %arg5: memref<64x128xbf16, #tpu.memory_space<vmem>>, %arg6: memref<64x128xbf16, #tpu.memory_space<vmem>>, %arg7: memref<128x64xbf16, #tpu.memory_space<vmem>>, %arg8: memref<2x64xf32, #tpu.memory_space<vmem>>) attributes {dimension_semantics = [#tpu.dimension_semantics<parallel>, #tpu.dimension_semantics<arbitrary>], iteration_bounds = array<i64: 1, 2>, scalar_prefetch = 0 : i64, scratch_operands = 0 : i64, tpu.core_type = #tpu.core_type<tc>, window_params = [{pipeline_mode = #tpu.pipeline_mode<synchronous>, transform_indices = @transform_0, window_bounds = array<i64: 2, 64>}, {transform_indices = @transform_1, window_bounds = array<i64: 2, 64>}, {pipeline_mode = #tpu.pipeline_mode<synchronous>, transform_indices = @transform_2, window_bounds = array<i64: 1, 64>}, {transform_indices = @transform_3, window_bounds = array<i64: 64, 128>}, {transform_indices = @transform_4, window_bounds = array<i64: 64, 128>}, {transform_indices = @transform_5, window_bounds = array<i64: 128, 64>}, {transform_indices = @transform_6, window_bounds = array<i64: 2, 64>}]} {
    %c0 = arith.constant 0 : index
    %c0_0 = arith.constant 0 : index
    %0 = vector.load %arg2[%c0, %c0_0] : memref<2x64xf32, #tpu.memory_space<vmem>>, vector<2x64xf32>
    %1 = arith.mulf %0, %0 : vector<2x64xf32>
    %cst = arith.constant dense<0.000000e+00> : vector<2xf32>
    %2 = vector.multi_reduction <add>, %1, %cst [1] : vector<2x64xf32> to vector<2xf32>
    %3 = vector.shape_cast %2 : vector<2xf32> to vector<2x1xf32>
    %cst_1 = arith.constant 6.400000e+01 : f32
    %4 = vector.broadcast %cst_1 : f32 to vector<2x1xf32>
    %5 = arith.divf %3, %4 : vector<2x1xf32>
    %cst_2 = arith.constant 9.99999974E-6 : f32
    %6 = vector.broadcast %cst_2 : f32 to vector<2x1xf32>
    %7 = arith.addf %5, %6 : vector<2x1xf32>
    %8 = math.rsqrt %7 : vector<2x1xf32>
    %9 = vector.broadcast %8 : vector<2x1xf32> to vector<2x64xf32>
    %10 = arith.mulf %0, %9 : vector<2x64xf32>
    %c0_3 = arith.constant 0 : index
    %c0_4 = arith.constant 0 : index
    %11 = vector.load %arg4[%c0_3, %c0_4] : memref<1x64xf32, #tpu.memory_space<vmem>>, vector<1x64xf32>
    %12 = vector.broadcast %11 : vector<1x64xf32> to vector<2x64xf32>
    %13 = arith.mulf %10, %12 : vector<2x64xf32>
    %14 = arith.truncf %13 : vector<2x64xf32> to vector<2x64xbf16>
    %c0_5 = arith.constant 0 : index
    %c0_6 = arith.constant 0 : index
    %15 = vector.load %arg5[%c0_5, %c0_6] : memref<64x128xbf16, #tpu.memory_space<vmem>>, vector<64x128xbf16>
    %cst_7 = arith.constant dense<0.000000e+00> : vector<2x128xf32>
    %16 = tpu.matmul %14, %15, %cst_7 {dimension_numbers = #tpu.dot_dimension_numbers<[1], [0], [0], [1], [0, 0, 1, 1], [], []>} : vector<2x64xbf16>, vector<64x128xbf16>, vector<2x128xf32> -> vector<2x128xf32>
    %c0_8 = arith.constant 0 : index
    %c0_9 = arith.constant 0 : index
    %17 = vector.load %arg6[%c0_8, %c0_9] : memref<64x128xbf16, #tpu.memory_space<vmem>>, vector<64x128xbf16>
    %cst_10 = arith.constant dense<0.000000e+00> : vector<2x128xf32>
    %18 = tpu.matmul %14, %17, %cst_10 {dimension_numbers = #tpu.dot_dimension_numbers<[1], [0], [0], [1], [0, 0, 1, 1], [], []>} : vector<2x64xbf16>, vector<64x128xbf16>, vector<2x128xf32> -> vector<2x128xf32>
    %19 = arith.negf %16 : vector<2x128xf32>
    %20 = math.exp %19 : vector<2x128xf32>
    %cst_11 = arith.constant 1.000000e+00 : f32
    %21 = vector.broadcast %cst_11 : f32 to vector<2x128xf32>
    %22 = arith.addf %21, %20 : vector<2x128xf32>
    %23 = arith.divf %21, %22 : vector<2x128xf32>
    %24 = arith.mulf %16, %23 : vector<2x128xf32>
    %25 = arith.mulf %24, %18 : vector<2x128xf32>
    %26 = arith.truncf %25 : vector<2x128xf32> to vector<2x128xbf16>
    %c0_12 = arith.constant 0 : index
    %c0_13 = arith.constant 0 : index
    %27 = vector.load %arg7[%c0_12, %c0_13] : memref<128x64xbf16, #tpu.memory_space<vmem>>, vector<128x64xbf16>
    %cst_14 = arith.constant dense<0.000000e+00> : vector<2x64xf32>
    %28 = tpu.matmul %26, %27, %cst_14 {dimension_numbers = #tpu.dot_dimension_numbers<[1], [0], [0], [1], [0, 0, 1, 1], [], []>} : vector<2x128xbf16>, vector<128x64xbf16>, vector<2x64xf32> -> vector<2x64xf32>
    %c0_i32 = arith.constant 0 : i32
    %29 = arith.cmpi eq, %arg1, %c0_i32 : i32
    %30 = arith.extui %29 : i1 to i32
    %c0_i32_15 = arith.constant 0 : i32
    %31 = arith.cmpi ne, %30, %c0_i32_15 : i32
    scf.if %31 {
      %c0_18 = arith.constant 0 : index
      %c0_19 = arith.constant 0 : index
      %35 = vector.load %arg3[%c0_18, %c0_19] : memref<2x64xf32, #tpu.memory_space<vmem>>, vector<2x64xf32>
      %36 = arith.addf %35, %28 : vector<2x64xf32>
      %c0_20 = arith.constant 0 : index
      %c0_21 = arith.constant 0 : index
      %37 = vector.load %arg8[%c0_20, %c0_21] : memref<2x64xf32, #tpu.memory_space<vmem>>, vector<2x64xf32>
      tpu.vector_store %arg8[%c0_20, %c0_21], %36 {strides = array<i32>} : memref<2x64xf32, #tpu.memory_space<vmem>>, vector<2x64xf32>,
    } else {
    }
    %c0_i32_16 = arith.constant 0 : i32
    %32 = arith.cmpi sgt, %arg1, %c0_i32_16 : i32
    %33 = arith.extui %32 : i1 to i32
    %c0_i32_17 = arith.constant 0 : i32
    %34 = arith.cmpi ne, %33, %c0_i32_17 : i32
    scf.if %34 {
      %c0_18 = arith.constant 0 : index
      %c0_19 = arith.constant 0 : index
      %35 = vector.load %arg8[%c0_18, %c0_19] : memref<2x64xf32, #tpu.memory_space<vmem>>, vector<2x64xf32>
      %36 = arith.addf %35, %28 : vector<2x64xf32>
      %c0_20 = arith.constant 0 : index
      %c0_21 = arith.constant 0 : index
      %37 = vector.load %arg8[%c0_20, %c0_21] : memref<2x64xf32, #tpu.memory_space<vmem>>, vector<2x64xf32>
      tpu.vector_store %arg8[%c0_20, %c0_21], %36 {strides = array<i32>} : memref<2x64xf32, #tpu.memory_space<vmem>>, vector<2x64xf32>,
    } else {
    }
    return
  }
  func.func @transform_0(%arg0: i32, %arg1: i32) -> (i32, i32) {
    %c0_i32 = arith.constant 0 : i32
    %c0_i32_0 = arith.constant 0 : i32
    %c0_i32_1 = arith.constant 0 : i32
    return %c0_i32, %c0_i32_0 : i32, i32
  }
  func.func @transform_1(%arg0: i32, %arg1: i32) -> (i32, i32) {
    %c0_i32 = arith.constant 0 : i32
    %c0_i32_0 = arith.constant 0 : i32
    return %c0_i32, %arg0 : i32, i32
  }
  func.func @transform_2(%arg0: i32, %arg1: i32) -> (i32, i32) {
    %c0_i32 = arith.constant 0 : i32
    %c0_i32_0 = arith.constant 0 : i32
    %c0_i32_1 = arith.constant 0 : i32
    return %c0_i32, %c0_i32_0 : i32, i32
  }
  func.func @transform_3(%arg0: i32, %arg1: i32) -> (i32, i32) {
    %c0_i32 = arith.constant 0 : i32
    %c0_i32_0 = arith.constant 0 : i32
    return %c0_i32, %arg1 : i32, i32
  }
  func.func @transform_4(%arg0: i32, %arg1: i32) -> (i32, i32) {
    %c0_i32 = arith.constant 0 : i32
    %c0_i32_0 = arith.constant 0 : i32
    return %c0_i32, %arg1 : i32, i32
  }
  func.func @transform_5(%arg0: i32, %arg1: i32) -> (i32, i32) {
    %c0_i32 = arith.constant 0 : i32
    return %arg1, %arg0 : i32, i32
  }
  func.func @transform_6(%arg0: i32, %arg1: i32) -> (i32, i32) {
    %c0_i32 = arith.constant 0 : i32
    %c0_i32_0 = arith.constant 0 : i32
    return %c0_i32, %arg0 : i32, i32
  }
}

module attributes {stable_mosaic.version = 11 : i64} {
  func.func @_rmsnorm_linear_kernel(%arg0: i32, %arg1: memref<2x64xf32, #tpu.memory_space<vmem>>, %arg2: memref<1x64xf32, #tpu.memory_space<vmem>>, %arg3: memref<64x128xbf16, #tpu.memory_space<vmem>>, %arg4: memref<2x128xf32, #tpu.memory_space<vmem>>) attributes {dimension_semantics = [#tpu.dimension_semantics<parallel>], iteration_bounds = array<i64: 1>, scalar_prefetch = 0 : i64, scratch_operands = 0 : i64, tpu.core_type = #tpu.core_type<tc>, window_params = [{pipeline_mode = #tpu.pipeline_mode<synchronous>, transform_indices = @transform_0, window_bounds = array<i64: 2, 64>}, {pipeline_mode = #tpu.pipeline_mode<synchronous>, transform_indices = @transform_1, window_bounds = array<i64: 1, 64>}, {transform_indices = @transform_2, window_bounds = array<i64: 64, 128>}, {transform_indices = @transform_3, window_bounds = array<i64: 2, 128>}]} {
    %c0 = arith.constant 0 : index
    %c0_0 = arith.constant 0 : index
    %0 = vector.load %arg1[%c0, %c0_0] : memref<2x64xf32, #tpu.memory_space<vmem>>, vector<2x64xf32>
    %1 = arith.mulf %0, %0 : vector<2x64xf32>
    %cst = arith.constant dense<0.000000e+00> : vector<2xf32>
    %2 = vector.multi_reduction <add>, %1, %cst [1] : vector<2x64xf32> to vector<2xf32>
    %3 = vector.shape_cast %2 : vector<2xf32> to vector<2x1xf32>
    %cst_1 = arith.constant 6.400000e+01 : f32
    %4 = vector.broadcast %cst_1 : f32 to vector<2x1xf32>
    %5 = arith.divf %3, %4 : vector<2x1xf32>
    %cst_2 = arith.constant 9.99999974E-6 : f32
    %6 = vector.broadcast %cst_2 : f32 to vector<2x1xf32>
    %7 = arith.addf %5, %6 : vector<2x1xf32>
    %8 = math.rsqrt %7 : vector<2x1xf32>
    %9 = vector.broadcast %8 : vector<2x1xf32> to vector<2x64xf32>
    %10 = arith.mulf %0, %9 : vector<2x64xf32>
    %c0_3 = arith.constant 0 : index
    %c0_4 = arith.constant 0 : index
    %11 = vector.load %arg2[%c0_3, %c0_4] : memref<1x64xf32, #tpu.memory_space<vmem>>, vector<1x64xf32>
    %12 = vector.broadcast %11 : vector<1x64xf32> to vector<2x64xf32>
    %13 = arith.mulf %10, %12 : vector<2x64xf32>
    %14 = arith.truncf %13 : vector<2x64xf32> to vector<2x64xbf16>
    %c0_5 = arith.constant 0 : index
    %c0_6 = arith.constant 0 : index
    %15 = vector.load %arg3[%c0_5, %c0_6] : memref<64x128xbf16, #tpu.memory_space<vmem>>, vector<64x128xbf16>
    %cst_7 = arith.constant dense<0.000000e+00> : vector<2x128xf32>
    %16 = tpu.matmul %14, %15, %cst_7 {dimension_numbers = #tpu.dot_dimension_numbers<[1], [0], [0], [1], [0, 0, 1, 1], [], []>} : vector<2x64xbf16>, vector<64x128xbf16>, vector<2x128xf32> -> vector<2x128xf32>
    %c0_8 = arith.constant 0 : index
    %c0_9 = arith.constant 0 : index
    %17 = vector.load %arg4[%c0_8, %c0_9] : memref<2x128xf32, #tpu.memory_space<vmem>>, vector<2x128xf32>
    tpu.vector_store %arg4[%c0_8, %c0_9], %16 {strides = array<i32>} : memref<2x128xf32, #tpu.memory_space<vmem>>, vector<2x128xf32>,
    return
  }
  func.func @transform_0(%arg0: i32) -> (i32, i32) {
    %c0_i32 = arith.constant 0 : i32
    %c0_i32_0 = arith.constant 0 : i32
    %c0_i32_1 = arith.constant 0 : i32
    return %c0_i32, %c0_i32_0 : i32, i32
  }
  func.func @transform_1(%arg0: i32) -> (i32, i32) {
    %c0_i32 = arith.constant 0 : i32
    %c0_i32_0 = arith.constant 0 : i32
    %c0_i32_1 = arith.constant 0 : i32
    return %c0_i32, %c0_i32_0 : i32, i32
  }
  func.func @transform_2(%arg0: i32) -> (i32, i32) {
    %c0_i32 = arith.constant 0 : i32
    %c0_i32_0 = arith.constant 0 : i32
    return %c0_i32, %arg0 : i32, i32
  }
  func.func @transform_3(%arg0: i32) -> (i32, i32) {
    %c0_i32 = arith.constant 0 : i32
    %c0_i32_0 = arith.constant 0 : i32
    return %c0_i32, %arg0 : i32, i32
  }
}

</mosaic_0001>

<bundles_post_ra>
// kernel: step.9
= control target key start
LH: loop header
LB: loop body
LE: loop exit
PB: predicated region body
PF: predicated region fallthrough
CT: control target
= control target key end

     0   :  { %vm17_vm0 = vcmask 517120   ;;  %v147_v4 = vmov 0.0   ;;  %vm148_vm1 = vmmov 0   ;;  %vm67_vm2 = vcmask 523264   ;;  %s190_s0 = inlined_call_operand.vmem [shape: f32[2,64], index: 0, kind: input, shape index: {}]   ;;  %s191_s2 = inlined_call_operand.vmem [shape: bf16[64,128], index: 2, kind: input, shape index: {}]   ;;  %s192_s1 = inlined_call_operand.vmem [shape: f32[1,64], index: 1, kind: input, shape index: {}]   ;;  %s193_s3 = inlined_call_operand.vmem [shape: f32[2,128], index: 3, kind: output, shape index: {}]  }
   0x1   :  { %v15_v0 = vld [vmem:[%s190_s0] sm:$0x3]  ;;  %127 = vmatprep.subr.bf16.mxu0 %v147_v4  ;;  %v142_v5 = vld [vmem:[%s191_s2 + $0x8] sm:$0xff]   ;;  %135 = vmatprep.mubr.msk.bf16.mxu0 %vm148_vm1, %v147_v4  ;;  %v143_v6 = vld [vmem:[%s191_s2 + $0x10] sm:$0xff]  }
   0x2   :  { %v16_v1 = vmul.f32 %v15_v0, %v15_v0  ;;  %v141_v3 = vld [vmem:[%s191_s2] sm:$0xff]   ;;  %v144_v7 = vld [vmem:[%s191_s2 + $0x18] sm:$0xff]  }
   0x3   :  { %128 = vmatpush3.bf16.msra.mxu0 %v141_v3  ;;  %v116_v12 = vld [vmem:[%s192_s1] ss:$0 sm:$0xff] }
   0x4   :  { %v18_v2 = vsel %vm17_vm0, %v16_v1, 0.0  ;;  %129 = vmatprep.subr.bf16.mxu0 %v147_v4 }
   0x5   :  { %19 = vadd.xlane.f32.xlu0 %v18_v2 }
   0x7   :  { %130 = vmatpush3.bf16.msra.mxu0 %v142_v5 }
   0x8   :  { %131 = vmatprep.subr.bf16.mxu0 %v147_v4 }
   0xb   :  { %132 = vmatpush3.bf16.msra.mxu0 %v143_v6 }
   0xc   :  { %133 = vmatprep.subr.bf16.mxu0 %v147_v4 }
   0xf   :  { %134 = vmatpush3.bf16.msra.mxu0 %v144_v7 }
  0x92   :  { %v20_v8 = vpop.xlane.xlu0 %19 }
  0x93   :  { %v22_v9 = vmul.f32 0.015625, %v20_v8 }
  0x95   :  { %v23_v10 = vadd.f32 1e-05, %v22_v9 }
  0x97   :  { %145 = vrsqrt.f32 %v23_v10 }
  0xa1   :  { %v146_v11 = vpop.eup %145 }
  0xa2   :  { %v25_v13 = vmul.f32 %v146_v11, %v15_v0 }
  0xa4   :  { %v33_v14 = vmul.f32 %v116_v12, %v25_v13 }
  0xa6   :  { %v34_v15 = vpack.c.bf16 %v33_v14, %v33_v14 }
  0xa8   :  { %136 = vmatmul.mubr.msk.bf16.vlgmr.msra.gmra.mrb[0].mxu0 %vm67_vm2, %v34_v15 }
 0x17b   :  { %v105_v16 = vpop.f32.mrb[0].mxu0 }
 0x17c   :  { %111 = vst [vmem:[%s193_s3] sm:$0x3] %v105_v16  ;;  %v137_v17 = vpop.f32.mrb[1].mxu0 }
 0x17d   :  { %v108_v18 = vpop.f32.mrb[2].mxu0 }
 0x17e   :  { %v138_v19 = vpop.f32.mrb[3].mxu0 }

// kernel: step.11
= control target key start
LH: loop header
LB: loop body
LE: loop exit
PB: predicated region body
PF: predicated region fallthrough
CT: control target
= control target key end

     0   :  { %v128_v0 = vmov 0.0   ;;  %vm129_vm0 = vmmov 0   ;;  %vm49_vm1 = vcmask 523264   ;;  %vm94_vm2 = vcmask 517120   ;;  %s171_s1 = inlined_call_operand.vmem [shape: bf16[64,64], index: 1, kind: input, shape index: {}]   ;;  %s172_s0 = inlined_call_operand.vmem [shape: bf16[2,64], index: 0, kind: input, shape index: {}]   ;;  %s173_s2 = inlined_call_operand.vmem [shape: f32[2,64], index: 2, kind: input, shape index: {}]   ;;  %s174_s3 = inlined_call_operand.vmem [shape: f32[2,64], index: 3, kind: output, shape index: {}]  }
   0x1   :  { %110 = vmatprep.subr.bf16.mxu0 %v128_v0  ;;  %v124_v1 = vld [vmem:[%s171_s1] sm:$0xff]   ;;  %118 = vmatprep.mubr.msk.bf16.mxu0 %vm129_vm0, %v128_v0  ;;  %v125_v2 = vld [vmem:[%s171_s1 + $0x8] sm:$0xff]   ;;  %v126_v3 = vld [vmem:[%s171_s1 + $0x10] sm:$0xff]  }
   0x2   :  { %111 = vmatpush3.bf16.msra.mxu0 %v124_v1  ;;  %v127_v4 = vld [vmem:[%s171_s1 + $0x18] sm:$0xff]   ;;  %v16_v5 = vld [vmem:[%s172_s0] sm:$0x1] }
   0x3   :  { %112 = vmatprep.subr.bf16.mxu0 %v128_v0  ;;  %v15_v6 = vld [vmem:[%s173_s2] sm:$0x3] }
   0x6   :  { %113 = vmatpush3.bf16.msra.mxu0 %v125_v2 }
   0x7   :  { %114 = vmatprep.subr.bf16.mxu0 %v128_v0 }
   0xa   :  { %115 = vmatpush3.bf16.msra.mxu0 %v126_v3 }
   0xb   :  { %116 = vmatprep.subr.bf16.mxu0 %v128_v0 }
   0xe   :  { %117 = vmatpush3.bf16.msra.mxu0 %v127_v4 }
  0x11   :  { %119 = vmatmul.mubr.msk.bf16.vlgmr.msra.gmra.mrb[0].mxu0 %vm49_vm1, %v16_v5 }
  0xe4   :  { %v87_v7 = vpop.f32.mrb[0].mxu0 }
  0xe5   :  { %v93_v8 = vadd.f32 %v87_v7, %v15_v6  ;;  %v120_v9 = vpop.f32.mrb[1].mxu0 }
  0xe6   :  { %v90_v10 = vpop.f32.mrb[2].mxu0 }
  0xe7   :  { %95 = vst.msk [vmem:[%s174_s3] sm:$0x3] %vm94_vm2, %v93_v8  ;;  %v121_v11 = vpop.f32.mrb[3].mxu0 }

// kernel: step.10
= control target key start
LH: loop header
LB: loop body
LE: loop exit
PB: predicated region body
PF: predicated region fallthrough
CT: control target
= control target key end

     0   :  { %s1033_s0 = inlined_call_operand.vmem [shape: s32[3], index: 0, kind: input, shape index: {}]   ;;  %s1034_s1 = inlined_call_operand.vmem [shape: bf16[2,2,2,16], index: 1, kind: input, shape index: {}]   ;;  %s1035_s2 = inlined_call_operand.vmem [shape: bf16[2,2,2,16,16], index: 2, kind: input, shape index: {}]   ;;  %s1036_s3 = inlined_call_operand.vmem [shape: bf16[2,2,2,16,16], index: 3, kind: input, shape index: {}]   ;;  %s1037_s4 = inlined_call_operand.vmem [shape: bf16[2,2,2,16], index: 4, kind: output, shape index: {}]  }
   0x1   :  { %s9_s17 = sshll.u32 %s1033_s0, 4  ;;  %s10_s17 = int_to_ptr.vmem [resolvable:$true] %s9_s17 }
   0x2   :  { %s821_s18 = scalar_lea.vmem %s10_s17, 16  ;;  %p826_p1 = scmp.lt.s32.totalorder %s10_s17, %s10_s17 }
   0x3   :  { %p822_p0 = scmp.ne.s32.totalorder %s10_s17, %s821_s18  ;;  %p827_p2 = scmp.lt.s32.totalorder %s821_s18, %s821_s18 }
   0x5   :  { %p828_p3 = por %p827_p2, %p826_p1 }
   0x7   :  { %p829_p4 = pnand %p828_p3, %p822_p0 }
   0x9   :  { %832 = shalt.err (!%p829_p4)  }
   0xa   :  { %s891_s19 = smov [#allocation6]  }
   0xb   :  { %12 = dma.vmem_to_smem %s10_s17, 16, %s891_s19, [#allocation5] }
   0xc   :  { %861 = dma.done.wait [#allocation5], 16 }
   0xd   :  { %862 = vsyncadd [#allocation5], 4294967280 }
   0xe   :  { %14 = sfence }
   0xf   :  { %s926_s20 = smov 0   ;;  %s928_s21 = smov 0  }
  0x10   :  { %s930_s22 = smov 0   ;;  %s932_s0 = smov 0  }
  0x11   :  { %s934_s23 = smov 0   ;;  %s936_s24 = smov 0  }
  0x12   :  { %s938_s25 = smov 0  }
  0x13 LB: > { %s32_s26 = sadd.s32 1, %s877_s0  ;;  %s35_s27 = sadd.s32 1, %s881_s23  ;;  %s889_s25 = sphi %s938_s25, %s20_s25   ;;  %s885_s24 = sphi %s936_s24, %s1047_s24   ;;  %s881_s23 = sphi %s934_s23, %s1046_s23   ;;  %s877_s0 = sphi %s932_s0, %s1045_s0   ;;  %s873_s22 = sphi %s930_s22, %s1044_s22   ;;  %s869_s21 = sphi %s928_s21, %s1043_s21   ;;  %s865_s20 = sphi %s926_s20, %s1042_s20  }
  0x14   : > { %p33_p5 = scmp.ge.s32.totalorder %s32_s26, 2  ;;  %p711_p6 = scmp.ge.s32.totalorder %s889_s25, 1 }
  0x15   : > { %p255_p7 = scmp.lt.s32.totalorder %s889_s25, 9  ;;  %s39_s28 = sadd.s32 1, %s885_s24 }
  0x16   : > { %s1049_s26 = smov (%p33_p5, %s32_s26), 0  ;;  %s1051_s27 = smov (!%p33_p5, %s35_s27), %s881_s23 }
  0x17   : > { %p256_p8 = pnand %p711_p6, %p255_p7  ;;  %p37_p9 = scmp.ge.s32.totalorder %s1051_s27, 2 }
  0x18   : > { %p323_p11 = scmp.lt.s32.totalorder (!%p256_p8), %s873_s22, 1  ;;  %p325_p12 = scmp.lt.s32.totalorder (!%p256_p8), %s869_s21, 1 }
  0x19   : > { %s1053_s27 = smov (%p37_p9, %s1051_s27), 0  ;;  %s1055_s28 = smov (!%p37_p9, %s39_s28), %s885_s24 }
  0x1a   : > { %p41_p10 = scmp.ge.s32.totalorder %s1055_s28, 2  ;;  %259 = sbr.rel (%p256_p8) target bundleno = 923 (0x39b), region = 32 }
  0x1b   : > { %s330_s29 = sld [smem:[#allocation6]] (!%p256_p8)  ;;  %s713_s30 = sld [smem:[#allocation6 + $0x2]] (!%p256_p8) }
  0x1c   : > { %s1057_s28 = smov (%p41_p10, %s1055_s28), 0  ;;  %s981_s13 = sld [smem:[#allocation6 + $0x1]] (!%p256_p8) }
  0x1d   : > { %1038 = sst [smem:[#allocation8_spill]] %s1057_s28  ;;  %p725_p2 = scmp.ne.s32.totalorder (!%p256_p8), %s865_s20, 0 }
  0x21   : > { %s1059_s22 = smov (!%p323_p11, %s873_s22), 1  ;;  %s1061_s21 = smov (!%p325_p12, %s869_s21), 1 }
  0x22   : > { %s712_s5 = sshll.u32 %s1059_s22, 1  ;;  %p332_p13 = scmp.lt.s32.totalorder %s865_s20, %s713_s30  ;;  %vm391_vm0 = vcmask (!%p725_p2), 1024   ;;  %vm394_vm1 = vcmask (!%p725_p2), 123904   ;;  %v892_v0 = vmov (!%p725_p2), -inf   ;;  %v893_v1 = vmov (!%p725_p2), 0.0  }
  0x23   : > { %s970_s6 = sadd.s32 %s712_s5, %s1061_s21  ;;  %p334_p0 = scmp.lt.s32.totalorder %s330_s29, 1  ;;  %392 = vst.msk [vmem:[#allocation2] sm:$0x3] (!%p725_p2), %vm391_vm0, %v892_v0  ;;  %393 = vst.msk [vmem:[#allocation3] sm:$0x3] (!%p725_p2), %vm391_vm0, %v893_v1 }
  0x24   : > { %s333_s14 = scalar_select %p332_p13, %s865_s20, %s713_s30 }
  0x25   : > { %s1063_s29 = smov (!%p334_p0, %s330_s29), 1  ;;  %s714_s15 = sshll.u32 %s1061_s21, 1  ;;  %395 = vst.msk [vmem:[#allocation4] sm:$0x3] (!%p725_p2), %vm394_vm1, %v893_v1 }
  0x26   : > { %p340_p1 = scmp.lt.s32.totalorder %s333_s14, 1  ;;  %s715_s16 = sshll.u32 %s1059_s22, 2 }
  0x27   : > { %s716_s17 = sshll.u32 %s1063_s29, 3  ;;  %390 = sbr.rel (%p725_p2) target bundleno = 46 (0x2e), region = 36 }
  0x28   : > { %s1065_s14 = smov (!%p340_p1, %s333_s14), 1 }
  0x29   : > { %s343_s18 = sadd.s32 %s714_s15, %s1065_s14 }
  0x2a   : > { %s345_s19 = sadd.s32 %s715_s16, %s343_s18 }
  0x2b   : > { %s347_s5 = sadd.s32 %s716_s17, %s345_s19 }
  0x2c   : > { %s717_s7 = sshll.u32 %s347_s5, 2 }
  0x2d   : > { %s349_s10 = scalar_lea.vmem %s1035_s2, %s717_s7  ;;  %s990_s28 = scalar_lea.vmem %s1036_s3, %s717_s7 }
  0x2e PF: > { %s726_s21 = sshll.u32 %s865_s20, 3 }
  0x2f   : > { %p727_p3 = scmp.gt.s32.totalorder %s726_s21, %s981_s13 }
  0x30   : > { %v402_v2 = vld [vmem:[%s349_s10] sm:$0xf] (!%p727_p3)  ;;  %vm404_vm2 = vcmask (!%p727_p3), 130048   ;;  %v894_v3 = vmov (!%p727_p3), 0.0   ;;  %vm895_vm3 = vmmov (!%p727_p3), 0   ;;  %s1039_s30 = scalar_lea.vmem (!%p727_p3), %s1034_s1, %s970_s6  ;;  %v452_v6 = vlaneseq (!%p727_p3) }
  0x31   : > { %400 = sbr.rel (%p727_p3) target bundleno = 777 (0x309), region = 40  ;;  %737 = vmatprep.subr.bf16.mxu0 (!%p727_p3), %v894_v3  ;;  %v409_v4 = vsel (!%p727_p3), %vm404_vm2, %v402_v2, 0  ;;  %739 = vmatprep.mubr.msk.bf16.mxu0 (!%p727_p3), %vm895_vm3, %v894_v3  ;;  %v401_v5 = vld [vmem:[%s1039_s30] sm:$0x1] (!%p727_p3)  ;;  %v454_v8 = vstv (!%p727_p3), %s726_s21  ;;  %v456_v10 = vstv (!%p727_p3), %s981_s13  ;;  %vm460_vm5 = vcmask (!%p727_p3), 58368  }
  0x32   : > { %738 = vmatpush3.bf16.xpose.msra.mxu0 (!%p727_p3), %v409_v4  ;;  %743 = vmatprep.subr.bf16.mxu1 (!%p727_p3), %v894_v3  ;;  %v453_v7 = vand.u32 (!%p727_p3), 127, %v452_v6  ;;  %v896_v18 = vmov (!%p727_p3), 0   ;;  %v459_v19 = vld [vmem:[#allocation2] sm:$0x3] (!%p727_p3)  ;;  %vm482_vm6 = vcmask (!%p727_p3), 1024   ;;  %vm496_vm7 = vcmask (!%p727_p3), 1043456  }
  0x33   : > { %745 = vmatprep.mubr.msk.bf16.mxu1 (!%p727_p3), %vm895_vm3, %v894_v3  ;;  %812 = vset.pattern.permute.xlu0 (!%p727_p3), %v896_v18  ;;  %v403_v23 = vld [vmem:[%s990_s28] sm:$0xf] (!%p727_p3)  ;;  %vm492_vm8 = vcmask (!%p727_p3), 64512   ;;  %v484_v37 = vld [vmem:[#allocation4] sm:$0x3] (!%p727_p3)  ;;  %vm541_vm9 = vcmask (!%p727_p3), 123904  }
  0x34   : > { %v455_v9 = vadd.s32 (!%p727_p3), %v454_v8, %v453_v7  ;;  %813 = vset.pattern.permute.xlu1 (!%p727_p3), %v896_v18  ;;  %v498_v24 = vsel (!%p727_p3), %vm496_vm7, %v403_v23, 0  ;;  %v476_v33 = vld [vmem:[#allocation3] sm:$0x3] (!%p727_p3) }
  0x35   : > { %744 = vmatpush3.bf16.msra.mxu1 (!%p727_p3), %v498_v24 }
  0x36   : > { %vm457_vm4 = vcmp.le.s32.totalorder (!%p727_p3), %v455_v9, %v456_v10 }
  0x39   : > { %740 = vmatmul.mubr.msk.bf16.vlgmr.msra.gmra.mrb[0].mxu0 %vm404_vm2, %v401_v5 }
 0x10c   : > { %v445_v11 = vpop.f32.mrb[0].mxu0 }
 0x10d   : > { %v451_v12 = vmul.f32 0.25, %v445_v11  ;;  %v741_v13 = vpop.f32.mrb[1].mxu0 }
 0x10e   : > { %v448_v14 = vpop.f32.mrb[2].mxu0 }
 0x10f   : > { %v742_v15 = vpop.f32.mrb[3].mxu0  ;;  %v458_v16 = vsel %vm457_vm4, %v451_v12, -inf }
 0x110   : > { %v461_v17 = vsel %vm460_vm5, %v458_v16, -inf }
 0x111   : > { %462 = vmax.xlane.f32.xlu0 %v461_v17 }
 0x19e   : > { %v463_v20 = vpop.xlane.xlu0 %462 }
 0x19f   : > { %v464_v21 = vmax.f32 %v459_v19, %v463_v20 }
 0x1a1   : > { %v465_v22 = vsub.f32 %v459_v19, %v464_v21  ;;  %543 = vst.msk [vmem:[#allocation2] sm:$0x3] %vm482_vm6, %v464_v21  ;;  %470 = vperm.xlu0 %812, %v464_v21  }
 0x1a3   : > { %v466_v31 = vmul.f32 1.442695, %v465_v22 }
 0x220   : > { %v471_v25 = vpop.permute.xlu0 %470 }
 0x221   : > { %v473_v26 = vsub.f32 %v458_v16, %v471_v25 }
 0x223   : > { %v474_v27 = vmul.f32 1.442695, %v473_v26 }
 0x225   : > { %814 = vpow2.f32 %v474_v27 }
 0x226   : > { %816 = vpow2.f32 %v466_v31 }
 0x22f   : > { %v815_v28 = vpop.eup %814 }
 0x230   : > { %v478_v29 = vsel %vm460_vm5, %v815_v28, 0.0  ;;  %v491_v30 = vpack.c.bf16 %v815_v28, %v815_v28  ;;  %v817_v32 = vpop.eup %816 }
 0x231   : > { %479 = vadd.xlane.f32.xlu1 %v478_v29  ;;  %v477_v34 = vmul.f32 %v817_v32, %v476_v33 }
 0x232   : > { %746 = vmatmul.mubr.msk.bf16.vlgmr.msra.gmra.mrb[0].mxu1 %vm492_vm8, %v491_v30 }
 0x242   : > { %487 = vperm.xlu1 %813, %v817_v32  }
 0x2be   : > { %v480_v35 = vpop.xlane.xlu1 %479 }
 0x2bf   : > { %v481_v36 = vadd.f32 %v480_v35, %v477_v34 }
 0x2c1   : > { %483 = vst.msk [vmem:[#allocation3] sm:$0x3] %vm482_vm6, %v481_v36 }
 0x2c2   : > { %v488_v38 = vpop.permute.xlu1 %487 }
 0x2c3   : > { %v490_v39 = vmul.f32 %v488_v38, %v484_v37 }
 0x305   : > { %v534_v40 = vpop.f32.mrb[0].mxu1 }
 0x306   : > { %v540_v41 = vadd.f32 %v534_v40, %v490_v39  ;;  %v747_v42 = vpop.f32.mrb[1].mxu1 }
 0x307   : > { %v537_v43 = vpop.f32.mrb[2].mxu1 }
 0x308   : > { %542 = vst.msk [vmem:[#allocation4] sm:$0x3] %vm541_vm9, %v540_v41  ;;  %v748_v44 = vpop.f32.mrb[3].mxu1 }
 0x309 PF: > { %p730_p4 = scmp.ne.s32.totalorder %s865_s20, 1 }
 0x30a   : > { %v549_v45 = vld [vmem:[#allocation3] sm:$0x3] (!%p730_p4)  ;;  %v897_v46 = vmov (!%p730_p4), 0   ;;  %vm558_vm10 = vcmask (!%p730_p4), 122880   ;;  %s1040_s12 = scalar_lea.vmem (!%p730_p4), %s1037_s4, %s970_s6 }
 0x30b   : > { %547 = sbr.rel (%p730_p4) target bundleno = 923 (0x39b), region = 44  ;;  %818 = vset.pattern.permute.xlu0 (!%p730_p4), %v897_v46  ;;  %819 = vrcp.f32 (!%p730_p4), %v549_v45 }
 0x30f   : > { %v548_v48 = vld [vmem:[#allocation4] sm:$0x3] (!%p730_p4) }
 0x315   : > { %v820_v47 = vpop.eup %819 }
 0x316   : > { %553 = vperm.xlu0 %818, %v820_v47  }
 0x395   : > { %v554_v49 = vpop.permute.xlu0 %553 }
 0x396   : > { %v556_v50 = vmul.f32 %v554_v49, %v548_v48 }
 0x398   : > { %v557_v51 = vpack.c.bf16 %v556_v50, %v556_v50 }
 0x39a   : > { %559 = vst.msk [vmem:[%s1040_s12] sm:$0x1] %vm558_vm10, %v557_v51 }
 0x39b PF: > { %s20_s25 = sadd.s32 1, %s889_s25   ;;  %s1041_s13 = sld [smem:[#allocation8_spill]] }
 0x39c   : > { %p17_p5 = scmp.ge.s32.totalorder %s20_s25, 10   ;;  %s1042_s20 = smov %s877_s0 }
 0x39d   : > { %s1043_s21 = smov %s881_s23  ;;  %s1044_s22 = smov %s885_s24 }
 0x39e   : > { %s1045_s0 = smov %s1049_s26  ;;  %s1046_s23 = smov %s1053_s27 }
 0x39f   :  { %19 = sbr.rel (!%p17_p5) target bundleno = 19 (0x13), region = 80 }
 0x3a1   : > { %s1047_s24 = smov %s1041_s13 }

// kernel: step.12
= control target key start
LH: loop header
LB: loop body
LE: loop exit
PB: predicated region body
PF: predicated region fallthrough
CT: control target
= control target key end

     0   :  { %s1121_s21 = smov 0   ;;  %s1123_s22 = smov 0   ;;  %s1244_s0 = inlined_call_operand.vmem [shape: f32[2,64], index: 0, kind: input, shape index: {}]   ;;  %s1245_s1 = inlined_call_operand.vmem [shape: f32[2,64], index: 1, kind: input, shape index: {}]   ;;  %s1246_s2 = inlined_call_operand.vmem [shape: f32[1,64], index: 2, kind: input, shape index: {}]   ;;  %s1247_s3 = inlined_call_operand.vmem [shape: bf16[64,256], index: 3, kind: input, shape index: {}]   ;;  %s1248_s4 = inlined_call_operand.vmem [shape: bf16[64,256], index: 4, kind: input, shape index: {}]   ;;  %s1249_s5 = inlined_call_operand.vmem [shape: bf16[256,64], index: 5, kind: input, shape index: {}]   ;;  %s1250_s6 = inlined_call_operand.vmem [shape: f32[2,64], index: 6, kind: output, shape index: {}]  }
   0x1   :  { %s1125_s23 = smov 0   ;;  %s1127_s24 = smov 0  }
   0x2   :  { %s1129_s25 = smov 0  }
   0x3 LB: > { %s25_s26 = sadd.s32 1, %s1078_s24  ;;  %p110_p1 = scmp.ne.s32.totalorder %s1070_s22, %s1066_s21  ;;  %s1082_s25 = sphi %s1129_s25, %s16_s25   ;;  %s1078_s24 = sphi %s1127_s24, %s1255_s24   ;;  %s1074_s23 = sphi %s1125_s23, %s1254_s23   ;;  %s1070_s22 = sphi %s1123_s22, %s1253_s22   ;;  %s1066_s21 = sphi %s1121_s21, %s1252_s21  }
   0x4   : > { %p26_p0 = scmp.ge.s32.totalorder %s25_s26, 2  ;;  %p111_p2 = scmp.eq.s32.totalorder %s1082_s25, 0 }
   0x5   : > { %s103_s29 = sadd.s32 1, %s1070_s22  ;;  %p882_p5 = scmp.ge.s32.totalorder %s1082_s25, 2 }
   0x6   : > { %s1257_s26 = smov (%p26_p0, %s25_s26), 0  ;;  %p1152_p3 = por %p111_p2, %p110_p1 }
   0x7   : > { %s100_s28 = ssub.s32 %s1078_s24, %s1257_s26  ;;  %229 = sbr.rel (%p882_p5) target bundleno = 32 (0x20), region = 28 }
   0x8   : > { %p101_p4 = scmp.eq.s32.totalorder %s100_s28, 0 }
   0xa   : > { %s1160_s30 = scalar_select %p101_p4, %s1070_s22, %s103_s29  }
   0xe   : > { %232 = sbr.rel (!%p1152_p3) target bundleno = 23 (0x17), region = 32  ;;  %s234_s7 = sand.u32 (%p1152_p3), 1, %s1070_s22  }
   0xf   : > { %s884_s8 = sshll.u32 (%p1152_p3), %s1078_s24, 2  ;;  %s883_s9 = sshll.u32 (%p1152_p3), %s234_s7, 5 }
  0x10   : > { %s238_s12 = scalar_lea.vmem (%p1152_p3), %s1247_s3, %s884_s8  ;;  %s236_s13 = scalar_lea.vmem (%p1152_p3), [#allocation2], %s883_s9 }
  0x11   : > { %v254_v0 = vld [vmem:[%s238_s12] sm:$0xf] (%p1152_p3)  ;;  %v256_v1 = vld [vmem:[%s238_s12 + $0x8] sm:$0xf] (%p1152_p3)  ;;  %v258_v2 = vld [vmem:[%s238_s12 + $0x10] sm:$0xf] (%p1152_p3) }
  0x12   : > { %255 = vst [vmem:[%s236_s13] sm:$0xf] (%p1152_p3), %v254_v0  ;;  %257 = vst [vmem:[%s236_s13 + $0x4] sm:$0xf] (%p1152_p3), %v256_v1  ;;  %v260_v3 = vld [vmem:[%s238_s12 + $0x18] sm:$0xf] (%p1152_p3) }
  0x13   : > { %v262_v4 = vld [vmem:[%s238_s12 + $0x20] sm:$0xf] (%p1152_p3)  ;;  %259 = vst [vmem:[%s236_s13 + $0x8] sm:$0xf] (%p1152_p3), %v258_v2  ;;  %261 = vst [vmem:[%s236_s13 + $0xc] sm:$0xf] (%p1152_p3), %v260_v3 }
  0x14   : > { %263 = vst [vmem:[%s236_s13 + $0x10] sm:$0xf] (%p1152_p3), %v262_v4  ;;  %v264_v5 = vld [vmem:[%s238_s12 + $0x28] sm:$0xf] (%p1152_p3)  ;;  %v266_v6 = vld [vmem:[%s238_s12 + $0x30] sm:$0xf] (%p1152_p3) }
  0x15   : > { %v268_v7 = vld [vmem:[%s238_s12 + $0x38] sm:$0xf]  ;;  %265 = vst [vmem:[%s236_s13 + $0x14] sm:$0xf] %v264_v5  ;;  %267 = vst [vmem:[%s236_s13 + $0x18] sm:$0xf] %v266_v6 }
  0x16   : > { %269 = vst [vmem:[%s236_s13 + $0x1c] sm:$0xf] %v268_v7 }
  0x17 PF: > { %308 = sbr.rel (!%p1152_p3) target bundleno = 32 (0x20), region = 73  ;;  %s310_s14 = sand.u32 (%p1152_p3), 1, %s1070_s22  }
  0x18   : > { %s886_s15 = sshll.u32 (%p1152_p3), %s1078_s24, 2  ;;  %s885_s16 = sshll.u32 (%p1152_p3), %s310_s14, 5 }
  0x19   : > { %s314_s19 = scalar_lea.vmem (%p1152_p3), %s1248_s4, %s886_s15  ;;  %s312_s20 = scalar_lea.vmem (%p1152_p3), [#allocation3], %s885_s16 }
  0x1a   : > { %v330_v8 = vld [vmem:[%s314_s19] sm:$0xf] (%p1152_p3)  ;;  %v332_v9 = vld [vmem:[%s314_s19 + $0x8] sm:$0xf] (%p1152_p3)  ;;  %v334_v10 = vld [vmem:[%s314_s19 + $0x10] sm:$0xf] (%p1152_p3) }
  0x1b   : > { %331 = vst [vmem:[%s312_s20] sm:$0xf] (%p1152_p3), %v330_v8  ;;  %333 = vst [vmem:[%s312_s20 + $0x4] sm:$0xf] (%p1152_p3), %v332_v9  ;;  %v336_v11 = vld [vmem:[%s314_s19 + $0x18] sm:$0xf] (%p1152_p3) }
  0x1c   : > { %v338_v12 = vld [vmem:[%s314_s19 + $0x20] sm:$0xf] (%p1152_p3)  ;;  %335 = vst [vmem:[%s312_s20 + $0x8] sm:$0xf] (%p1152_p3), %v334_v10  ;;  %337 = vst [vmem:[%s312_s20 + $0xc] sm:$0xf] (%p1152_p3), %v336_v11 }
  0x1d   : > { %339 = vst [vmem:[%s312_s20 + $0x10] sm:$0xf] (%p1152_p3), %v338_v12  ;;  %v340_v13 = vld [vmem:[%s314_s19 + $0x28] sm:$0xf] (%p1152_p3)  ;;  %v342_v14 = vld [vmem:[%s314_s19 + $0x30] sm:$0xf] (%p1152_p3) }
  0x1e   : > { %v344_v15 = vld [vmem:[%s314_s19 + $0x38] sm:$0xf]  ;;  %341 = vst [vmem:[%s312_s20 + $0x14] sm:$0xf] %v340_v13  ;;  %343 = vst [vmem:[%s312_s20 + $0x18] sm:$0xf] %v342_v14 }
  0x1f   : > { %345 = vst [vmem:[%s312_s20 + $0x1c] sm:$0xf] %v344_v15 }
  0x20 PF: > { %p887_p6 = scmp.ge.s32.totalorder %s1082_s25, 1  ;;  %p395_p7 = scmp.lt.s32.totalorder %s1082_s25, 3 }
  0x22   : > { %p396_p8 = pnand %p887_p6, %p395_p7 }
  0x23   : > { %v471_v16 = vld [vmem:[%s1244_s0] sm:$0x3] (!%p396_p8)  ;;  %vm473_vm0 = vcmask (!%p396_p8), 517120   ;;  %s402_s29 = sand.u32 (!%p396_p8), 1, %s1066_s21   ;;  %v1084_v20 = vmov (!%p396_p8), 0.0   ;;  %vm1085_vm1 = vmmov (!%p396_p8), 0  }
  0x24   : > { %399 = sbr.rel (%p396_p8) target bundleno = 671 (0x29f), region = 118  ;;  %v472_v17 = vmul.f32 (!%p396_p8), %v471_v16, %v471_v16  ;;  %s888_s7 = sshll.u32 (!%p396_p8), %s402_s29, 5  ;;  %936 = vmatprep.subr.bf16.mxu1 (!%p396_p8), %v1084_v20  ;;  %960 = vmatprep.subr.bf16.mxu0 (!%p396_p8), %v1084_v20  ;;  %v892_v28 = vld [vmem:[%s1246_s2] ss:$0 sm:$0xff] (!%p396_p8)  ;;  %vm523_vm2 = vcmask (!%p396_p8), 523264  }
  0x25   : > { %s404_s8 = scalar_lea.vmem (!%p396_p8), [#allocation2], %s888_s7  ;;  %944 = vmatprep.mubr.msk.bf16.mxu1 (!%p396_p8), %vm1085_vm1, %v1084_v20  ;;  %s411_s9 = scalar_lea.vmem (!%p396_p8), [#allocation3], %s888_s7  ;;  %976 = vmatprep.mubr.msk.bf16.mxu0 (!%p396_p8), %vm1085_vm1, %v1084_v20 }
  0x26   : > { %v474_v18 = vsel (!%p396_p8), %vm473_vm0, %v472_v17, 0.0  ;;  %v1022_v19 = vld [vmem:[%s404_s8] sm:$0xff] (!%p396_p8)   ;;  %v1023_v21 = vld [vmem:[%s404_s8 + $0x8] sm:$0xff] (!%p396_p8)   ;;  %v1024_v22 = vld [vmem:[%s404_s8 + $0x10] sm:$0xff] (!%p396_p8)   ;;  %s890_s11 = sshll.u32 (!%p396_p8), %s1074_s23, 4  ;;  %p912_p10 = scmp.ne.s32.totalorder (!%p396_p8), %s1074_s23, 0 }
  0x27   : > { %475 = vadd.xlane.f32.xlu0 (!%p396_p8), %v474_v18  ;;  %937 = vmatpush3.bf16.msra.mxu1 (!%p396_p8), %v1022_v19  ;;  %v1025_v23 = vld [vmem:[%s404_s8 + $0x18] sm:$0xff] (!%p396_p8)   ;;  %v1026_v31 = vld [vmem:[%s411_s9] sm:$0xff] (!%p396_p8)   ;;  %v1027_v33 = vld [vmem:[%s411_s9 + $0x8] sm:$0xff] (!%p396_p8)   ;;  %p458_p9 = scmp.lt.s32.totalorder (!%p396_p8), %s890_s11, 31 }
  0x28   : > { %938 = vmatprep.subr.bf16.mxu1 (!%p396_p8), %v1084_v20  ;;  %v1028_v34 = vld [vmem:[%s411_s9 + $0x10] sm:$0xff] (!%p396_p8)   ;;  %v1029_v35 = vld [vmem:[%s411_s9 + $0x18] sm:$0xff] (!%p396_p8)  }
  0x2b   : > { %939 = vmatpush3.bf16.msra.mxu1 %v1023_v21  ;;  %s1259_s11 = smov (!%p458_p9, %s890_s11), 31  ;;  %v756_v63 = vld [vmem:[%s1245_s1] sm:$0x3] (!%p912_p10) }
  0x2c   : > { %940 = vmatprep.subr.bf16.mxu1 %v1084_v20  ;;  %s891_s12 = sshll.u32 %s1259_s11, 2 }
  0x2d   : > { %s464_s15 = scalar_lea.vmem %s1249_s5, %s891_s12 }
  0x2e   : > { %v1030_v36 = vld [vmem:[%s464_s15] sm:$0xff]   ;;  %v1031_v37 = vld [vmem:[%s464_s15 + $0x8] sm:$0xff]   ;;  %v1032_v38 = vld [vmem:[%s464_s15 + $0x10] sm:$0xff]  }
  0x2f   : > { %941 = vmatpush3.bf16.msra.mxu1 %v1024_v22  ;;  %961 = vmatpush3.bf16.msra.mxu0 %v1030_v36  ;;  %v1033_v39 = vld [vmem:[%s464_s15 + $0x18] sm:$0xff]   ;;  %v1034_v40 = vld [vmem:[%s464_s15 + $0x20] sm:$0xff]   ;;  %v1035_v41 = vld [vmem:[%s464_s15 + $0x28] sm:$0xff]  }
  0x30   : > { %942 = vmatprep.subr.bf16.mxu1 %v1084_v20  ;;  %962 = vmatprep.subr.bf16.mxu0 %v1084_v20  ;;  %v1036_v42 = vld [vmem:[%s464_s15 + $0x30] sm:$0xff]   ;;  %v1037_v43 = vld [vmem:[%s464_s15 + $0x38] sm:$0xff]  }
  0x33   : > { %943 = vmatpush3.bf16.msra.mxu1 %v1025_v23  ;;  %963 = vmatpush3.bf16.msra.mxu0 %v1031_v37 }
  0x34   : > { %948 = vmatprep.subr.bf16.mxu1 %v1084_v20  ;;  %964 = vmatprep.subr.bf16.mxu0 %v1084_v20 }
  0x37   : > { %965 = vmatpush3.bf16.msra.mxu0 %v1032_v38 }
  0x38   : > { %966 = vmatprep.subr.bf16.mxu0 %v1084_v20 }
  0x3b   : > { %967 = vmatpush3.bf16.msra.mxu0 %v1033_v39 }
  0x3c   : > { %968 = vmatprep.subr.bf16.mxu0 %v1084_v20 }
  0x3f   : > { %969 = vmatpush3.bf16.msra.mxu0 %v1034_v40 }
  0x40   : > { %970 = vmatprep.subr.bf16.mxu0 %v1084_v20 }
  0x43   : > { %971 = vmatpush3.bf16.msra.mxu0 %v1035_v41 }
  0x44   : > { %972 = vmatprep.subr.bf16.mxu0 %v1084_v20 }
  0x47   : > { %973 = vmatpush3.bf16.msra.mxu0 %v1036_v42 }
  0x48   : > { %974 = vmatprep.subr.bf16.mxu0 %v1084_v20 }
  0x4b   : > { %975 = vmatpush3.bf16.msra.mxu0 %v1037_v43 }
  0xb4   : > { %v476_v24 = vpop.xlane.xlu0 %475 }
  0xb5   : > { %v478_v25 = vmul.f32 0.015625, %v476_v24 }
  0xb7   : > { %v479_v26 = vadd.f32 1e-05, %v478_v25 }
  0xb9   : > { %1038 = vrsqrt.f32 %v479_v26 }
  0xc3   : > { %v1039_v27 = vpop.eup %1038 }
  0xc4   : > { %v481_v29 = vmul.f32 %v1039_v27, %v471_v16 }
  0xc6   : > { %v489_v30 = vmul.f32 %v892_v28, %v481_v29 }
  0xc8   : > { %v490_v32 = vpack.c.bf16 %v489_v30, %v489_v30 }
  0xca   : > { %945 = vmatmul.mubr.msk.bf16.vlgmr.msra.gmra.mrb[0].mxu1 %vm523_vm2, %v490_v32 }
  0xcb   : > { %949 = vmatpush3.bf16.msra.mxu1 %v1026_v31  ;;  %956 = vmatprep.mubr.msk.bf16.mxu1 %vm1085_vm1, %v1084_v20 }
  0xcc   : > { %950 = vmatprep.subr.bf16.mxu1 %v1084_v20 }
  0xcf   : > { %951 = vmatpush3.bf16.msra.mxu1 %v1027_v33 }
  0xd0   : > { %952 = vmatprep.subr.bf16.mxu1 %v1084_v20 }
  0xd3   : > { %953 = vmatpush3.bf16.msra.mxu1 %v1028_v34 }
  0xd4   : > { %954 = vmatprep.subr.bf16.mxu1 %v1084_v20 }
  0xd7   : > { %955 = vmatpush3.bf16.msra.mxu1 %v1029_v35 }
  0xda   : > { %957 = vmatmul.mubr.msk.bf16.vlgmr.msra.gmra.mrb[4].mxu1 %vm523_vm2, %v490_v32 }
 0x19d   : > { %v561_v44 = vpop.f32.mrb[0].mxu1 }
 0x19e   : > { %v903_v45 = vmul.f32 -1.442695, %v561_v44  ;;  %v946_v46 = vpop.f32.mrb[1].mxu1 }
 0x19f   : > { %v564_v47 = vpop.f32.mrb[2].mxu1 }
 0x1a0   : > { %1040 = vpow2.f32 %v903_v45  ;;  %v947_v48 = vpop.f32.mrb[3].mxu1 }
 0x1aa   : > { %v1041_v49 = vpop.eup %1040 }
 0x1ab   : > { %v642_v50 = vadd.f32 1.0, %v1041_v49 }
 0x1ad   : > { %1042 = vrcp.f32 %v642_v50  ;;  %v633_v51 = vpop.f32.mrb[4].mxu1 }
 0x1ae   : > { %v958_v52 = vpop.f32.mrb[5].mxu1 }
 0x1af   : > { %v636_v53 = vpop.f32.mrb[6].mxu1 }
 0x1b0   : > { %v959_v54 = vpop.f32.mrb[7].mxu1 }
 0x1b7   : > { %v1043_v55 = vpop.eup %1042 }
 0x1b8   : > { %v645_v56 = vmul.f32 %v1043_v55, %v561_v44 }
 0x1ba   : > { %v646_v57 = vmul.f32 %v645_v56, %v633_v51 }
 0x1bc   : > { %v647_v58 = vpack.c.bf16 %v646_v57, %v646_v57 }
 0x1be   : > { %977 = vmatmul.mubr.bf16.vlgmr.msra.gmra.mrb[0].mxu0 %v647_v58 }
 0x28e   : > { %755 = sbr.rel (%p912_p10) target bundleno = 661 (0x295), region = 130 }
 0x291   : > { %v746_v59 = vpop.f32.mrb[0].mxu0 }
 0x292   : > { %v978_v60 = vpop.f32.mrb[1].mxu0  ;;  %v757_v0 = vadd.f32 (!%p912_p10), %v756_v63, %v746_v59 }
 0x293   : > { %v749_v61 = vpop.f32.mrb[2].mxu0 }
 0x294   : > { %v979_v62 = vpop.f32.mrb[3].mxu0  ;;  %758 = vst.msk [vmem:[%s1250_s6] sm:$0x3] (!%p912_p10), %vm473_vm0, %v757_v0 }
 0x295 PF: > { %p913_p11 = scmp.le.s32.totalorder %s1074_s23, 0 }
 0x297   : > { %762 = sbr.rel (%p913_p11) target bundleno = 671 (0x29f), region = 134 }
 0x29b   : > { %v763_v1 = vld [vmem:[%s1250_s6] sm:$0x3] (!%p913_p11) }
 0x29c   : > { %v764_v2 = vadd.f32 (!%p913_p11), %v763_v1, %v746_v59 }
 0x29e   : > { %765 = vst.msk [vmem:[%s1250_s6] sm:$0x3] %vm473_vm0, %v764_v2 }
 0x29f PF: > { %s16_s25 = sadd.s32 1, %s1082_s25   ;;  %s1252_s21 = smov %s1070_s22 }
 0x2a0   : > { %p13_p12 = scmp.ge.s32.totalorder %s16_s25, 4   ;;  %s1253_s22 = smov %s1160_s30 }
 0x2a1   : > { %s1254_s23 = smov %s1078_s24  ;;  %s1255_s24 = smov %s1257_s26 }
 0x2a2   :  { %15 = sbr.rel (!%p13_p12) target bundleno = 3 (0x3), region = 183 }

// kernel: step.17
= control target key start
LH: loop header
LB: loop body
LE: loop exit
PB: predicated region body
PF: predicated region fallthrough
CT: control target
= control target key end

     0   :  { %vm18_vm0 = vcmask 517120   ;;  %s236_s0 = inlined_call_operand.vmem [shape: f32[2,64], index: 0, kind: input, shape index: {}]   ;;  %s237_s1 = inlined_call_operand.vmem [shape: f32[1,64], index: 1, kind: input, shape index: {}]   ;;  %s238_s2 = inlined_call_operand.vmem [shape: bf16[64,128], index: 2, kind: input, shape index: {}]   ;;  %s239_s3 = inlined_call_operand.hbm [shape: f32[2,128], index: 3, kind: output, shape index: {}]  }
   0x1   :  { %v16_v0 = vld [vmem:[%s236_s0] sm:$0x3] }
   0x2   :  { %v17_v1 = vmul.f32 %v16_v0, %v16_v0 }
   0x4   :  { %v19_v2 = vsel %vm18_vm0, %v17_v1, 0.0 }
   0x5   :  { %8 = vsyncpa [#allocation3], 0  ;;  %20 = vadd.xlane.f32.xlu0 %v19_v2  ;;  %v153_v3 = vld [vmem:[%s238_s2] sm:$0xff]   ;;  %v183_v4 = vmov 0.0   ;;  %vm184_vm1 = vmmov 0   ;;  %v154_v5 = vld [vmem:[%s238_s2 + $0x8] sm:$0xff]  }
   0x6   :  { %138 = vmatprep.subr.bf16.mxu0 %v183_v4  ;;  %146 = vmatprep.mubr.msk.bf16.mxu0 %vm184_vm1, %v183_v4  ;;  %v155_v6 = vld [vmem:[%s238_s2 + $0x10] sm:$0xff]   ;;  %v156_v7 = vld [vmem:[%s238_s2 + $0x18] sm:$0xff]   ;;  %v127_v12 = vld [vmem:[%s237_s1] ss:$0 sm:$0xff]  ;;  %vm68_vm2 = vcmask 523264   ;;  %s185_s23 = smov [#allocation2]  }
   0x7   :  { %139 = vmatpush3.bf16.msra.mxu0 %v153_v3  ;;  %s119_s24 = sshll.u32 %s185_s23, 4  ;;  %s120_s24 = int_to_ptr.vmem [resolvable:$true] %s119_s24 }
   0x8   :  { %140 = vmatprep.subr.bf16.mxu0 %v183_v4  ;;  %s159_s2 = scalar_lea.vmem %s120_s24, 32  ;;  %p164_p1 = scmp.lt.s32.totalorder %s120_s24, %s120_s24 }
   0x9   :  { %p160_p0 = scmp.ne.s32.totalorder %s120_s24, %s159_s2  ;;  %p165_p2 = scmp.lt.s32.totalorder %s159_s2, %s159_s2 }
   0xb   :  { %141 = vmatpush3.bf16.msra.mxu0 %v154_v5  ;;  %p166_p3 = por %p165_p2, %p164_p1 }
   0xc   :  { %142 = vmatprep.subr.bf16.mxu0 %v183_v4 }
   0xd   :  { %p167_p4 = pnand %p166_p3, %p160_p0 }
   0xf   :  { %143 = vmatpush3.bf16.msra.mxu0 %v155_v6 }
  0x10   :  { %144 = vmatprep.subr.bf16.mxu0 %v183_v4 }
  0x13   :  { %145 = vmatpush3.bf16.msra.mxu0 %v156_v7 }
  0x92   :  { %v21_v8 = vpop.xlane.xlu0 %20 }
  0x93   :  { %v23_v9 = vmul.f32 0.015625, %v21_v8 }
  0x95   :  { %v24_v10 = vadd.f32 1e-05, %v23_v9 }
  0x97   :  { %157 = vrsqrt.f32 %v24_v10 }
  0xa1   :  { %v158_v11 = vpop.eup %157 }
  0xa2   :  { %v26_v13 = vmul.f32 %v158_v11, %v16_v0 }
  0xa4   :  { %v34_v14 = vmul.f32 %v127_v12, %v26_v13 }
  0xa6   :  { %v35_v15 = vpack.c.bf16 %v34_v14, %v34_v14 }
  0xa8   :  { %147 = vmatmul.mubr.msk.bf16.vlgmr.msra.gmra.mrb[0].mxu0 %vm68_vm2, %v35_v15 }
 0x17b   :  { %v106_v16 = vpop.f32.mrb[0].mxu0 }
 0x17c   :  { %112 = vst [vmem:[#allocation2] sm:$0x3] %v106_v16  ;;  %v148_v17 = vpop.f32.mrb[1].mxu0 }
 0x17d   :  { %v109_v18 = vpop.f32.mrb[2].mxu0 }
 0x17e   :  { %170 = shalt.err (!%p167_p4)
}
 0x17f   :  { %s171_s26 = scalar_lea.hbm %s239_s3, 32 }
 0x180   :  { %p172_p5 = scmp.ne.s32.totalorder %s239_s3, %s171_s26  ;;  %p175_p6 = scmp.lt.u32.totalorder %s171_s26, %s239_s3 }
 0x182   :  { %p177_p7 = pnand %p175_p6, %p172_p5 }
 0x184   :  { %180 = shalt.err (!%p177_p7)
}
 0x185   :  { %122 = dma.vmem_to_hbm [thread:$0]  %s120_s24, 32, %s239_s3, [#allocation3]   ;;  %v149_v19 = vpop.f32.mrb[3].mxu0 }
 0x186   :  { %181 = dma.done.wait [#allocation3], 32  }
 0x187   :  { %182 = vsyncadd [#allocation3], 4294967264 }
 0x188   :  { %126 = vsyncpa [#allocation3], 1 }

</bundles_post_ra>
